<compile_context>
chip_gen: v7x
topology: tpu7x:2x2x1
jax: 0.10.0
libtpu: 0.0.40
codegen_flags: <defaults>
</compile_context>

<pallas_src>
import functools

import jax
import jax.numpy as jnp
from jax.experimental import pallas as pl
from jax.experimental.pallas import tpu as pltpu


def _cosformer_kernel(x_ref, wq_ref, bq_ref, wk_ref, bk_ref, wv_ref, bv_ref,
                      wo_ref, bo_ref, out_ref,
                      kvs_acc, kvc_acc, ksum_s, ksum_c, p_oh, pt_oh,
                      *, num_heads, head_dim, eps, seq_len, compute_dtype):
    f32 = jnp.float32
    cd = compute_dtype
    E = num_heads * head_dim
    TL = x_ref.shape[1]
    phase = pl.program_id(1)
    chunk = pl.program_id(2)
    n_chunks = pl.num_programs(2)

    # ---- once per batch element: reset accumulators, build head one-hot matrices ----------
    # (done per-b, not only at the global first step, so megacore b-sharding stays correct)
    @pl.when((phase == 0) & (chunk == 0))
    def _init():
        kvs_acc[...] = jnp.zeros_like(kvs_acc)
        kvc_acc[...] = jnp.zeros_like(kvc_acc)
        ksum_s[...] = jnp.zeros_like(ksum_s)
        ksum_c[...] = jnp.zeros_like(ksum_c)
        # "lane d belongs to head h" one-hots, from int32 iota + compares (no division).
        d_i = jax.lax.broadcasted_iota(jnp.int32, (E, num_heads), 0)
        h_i = jax.lax.broadcasted_iota(jnp.int32, (E, num_heads), 1)
        p_oh[...] = ((d_i >= h_i * head_dim) & (d_i < (h_i + 1) * head_dim)).astype(f32)
        h_j = jax.lax.broadcasted_iota(jnp.int32, (num_heads, E), 0)
        d_j = jax.lax.broadcasted_iota(jnp.int32, (num_heads, E), 1)
        pt_oh[...] = ((d_j >= h_j * head_dim) & (d_j < (h_j + 1) * head_dim)).astype(f32)

    x = x_ref[0]                                                    # (TL, E), compute dtype

    # Cosformer positional re-weighting for this chunk's global positions (EUP, ~2*TL ops).
    pos = (jax.lax.broadcasted_iota(jnp.int32, (TL, 1), 0) + chunk * TL + 1).astype(f32)
    ang = pos * (jnp.pi / (2.0 * seq_len))
    sin_w = jnp.sin(ang)                                            # (TL, 1)
    cos_w = jnp.cos(ang)

    # ---- phase 0: accumulate K^T V (sin / cos branches) and the K column sums --------------
    @pl.when(phase == 0)
    def _phase0():
        k = jnp.maximum(
            jnp.dot(x, wk_ref[...], preferred_element_type=f32) + bk_ref[...], 0.0)
        v = (jnp.dot(x, wv_ref[...], preferred_element_type=f32) + bv_ref[...]).astype(cd)
        ks = k * sin_w
        kc = k * cos_w
        dn = (((0,), (0,)), ((), ()))                               # contract over the L axis
        kvs_acc[...] += jax.lax.dot_general(ks.astype(cd), v, dn,
                                            preferred_element_type=f32)
        kvc_acc[...] += jax.lax.dot_general(kc.astype(cd), v, dn,
                                            preferred_element_type=f32)
        ksum_s[...] += jnp.sum(ks, axis=0, keepdims=True)
        ksum_c[...] += jnp.sum(kc, axis=0, keepdims=True)

    # After the last phase-0 chunk, restrict the accumulated kv to the head-block-diagonal
    # exactly once (mask = P @ P^T, a tiny (E,H)x(H,E) matmul; no (E,E) mask kept in VMEM).
    @pl.when((phase == 0) & (chunk == n_chunks - 1))
    def _mask_kv():
        mask = jnp.dot(p_oh[...], pt_oh[...], preferred_element_type=f32)   # (E, E) 0/1
        kvs_acc[...] *= mask
        kvc_acc[...] *= mask

    # ---- phase 1: re-project q for this chunk, apply accumulated kv, write output chunk ----
    @pl.when(phase == 1)
    def _phase1():
        q = jnp.maximum(
            jnp.dot(x, wq_ref[...], preferred_element_type=f32) + bq_ref[...], 0.0)
        qs = q * sin_w
        qc = q * cos_w

        # Numerator: full-width MXU matmuls; heads stay isolated because kv is block-diagonal.
        o = (jnp.dot(qs.astype(cd), kvs_acc[...].astype(cd),
                     preferred_element_type=f32) +
             jnp.dot(qc.astype(cd), kvc_acc[...].astype(cd),
                     preferred_element_type=f32))                   # (TL, E) f32

        # Denominator: per-head reduce + broadcast through the small one-hots
        # (~4*TL*E*H flops instead of the 2*TL*E^2 of a full block-mask matmul).
        t = qs * ksum_s[...] + qc * ksum_c[...]                     # (TL, E) f32
        per_head = jnp.dot(t, p_oh[...], preferred_element_type=f32)        # (TL, H)
        denom = jnp.dot(per_head, pt_oh[...], preferred_element_type=f32)   # (TL, E)
        z = 1.0 / jnp.maximum(denom, eps)   # exact reciprocal for parity with the reference

        attn = (o * z).astype(wo_ref.dtype)
        out = jnp.dot(attn, wo_ref[...], preferred_element_type=f32) + bo_ref[...]
        out_ref[0] = out.astype(out_ref.dtype)


def _pick_chunk(seq_len, max_chunk):
    """Largest chunk <= max_chunk that divides seq_len and keeps (8,128)-friendly blocks."""
    if seq_len <= max_chunk:
        return seq_len
    for tl in range(min(max_chunk, seq_len), 7, -1):
        if seq_len % tl == 0 and tl % 8 == 0:
            return tl
    # TODO(synk): pad + mask rows in-kernel for awkward sequence lengths; fall back to no chunking.
    return seq_len


def _resident_spec(shape):
    """Grid-invariant input: constant index_map + single buffering (no wasted 2nd buffer)."""
    index_map = lambda b, p, c: (0,) * len(shape)
    if hasattr(pl, "Buffered"):
        try:
            return pl.BlockSpec(shape, index_map, pipeline_mode=pl.Buffered(1))
        except TypeError:
            pass
    return pl.BlockSpec(shape, index_map)


def cosformer_attention(x, params, *, num_heads, eps=1e-4,
                        compute_dtype=jnp.float32, max_chunk=512):
    """x: (B, L, E) float32 -> (B, L, E) float32 (batch-first self-attention path).

    compute_dtype=jnp.bfloat16 is recommended on v6e/v7x: all matmul operands are cast to it
    while every accumulation stays in f32. In production, jit the caller so the param casts
    are materialized once.
    """
    B, L, E = x.shape
    head_dim = E // num_heads
    assert head_dim * num_heads == E, "embed_dim must be divisible by num_heads"

    cd = jnp.dtype(compute_dtype)
    f32 = jnp.float32

    TL = _pick_chunk(L, max_chunk)
    n_chunks = L // TL
    assert n_chunks * TL == L

    x_c = x.astype(cd)
    wq = params["wq"].astype(cd); bq = params["bq"].astype(f32)
    wk = params["wk"].astype(cd); bk = params["bk"].astype(f32)
    wv = params["wv"].astype(cd); bv = params["bv"].astype(f32)
    wo = params["wo"].astype(cd); bo = params["bo"].astype(f32)

    kernel = functools.partial(_cosformer_kernel, num_heads=num_heads,
                               head_dim=head_dim, eps=eps, seq_len=L,
                               compute_dtype=cd)

    # VMEM budget from actual tile sizes: weights single-buffered, x/out double-buffered,
    # persistent f32 accumulators + one-hots, ~10 live (TL, E) f32 intermediates plus one
    # transient (E, E) mask.  Clamped to ~85% of this generation's physical VMEM.
    weight_bytes = 4 * E * E * cd.itemsize + 4 * E * 4
    io_bytes = 2 * TL * E * cd.itemsize + 2 * TL * E * 4
    scratch_bytes = 2 * E * E * 4 + 2 * E * 4 + 2 * E * num_heads * 4
    live_bytes = 10 * TL * E * 4 + E * E * 4
    est = int(1.4 * (weight_bytes + io_bytes + scratch_bytes + live_bytes))
    try:
        vmem_cap = int(0.85 * pltpu.get_tpu_info().vmem_capacity_bytes)
    except Exception:
        vmem_cap = int(0.85 * 64 * 1024 * 1024)   # conservative (v7x-sized) fallback
    vmem_limit = int(min(max(est, 16 * 1024 * 1024), vmem_cap))

    in_specs = [
        pl.BlockSpec((1, TL, E), lambda b, p, c: (b, c, 0)),   # x: re-read in both phases
        _resident_spec((E, E)),   # wq
        _resident_spec((1, E)),   # bq
        _resident_spec((E, E)),   # wk
        _resident_spec((1, E)),   # bk
        _resident_spec((E, E)),   # wv
        _resident_spec((1, E)),   # bv
        _resident_spec((E, E)),   # wo
        _resident_spec((1, E)),   # bo
    ]
    # Phase 0 never writes the output: pin its output block at chunk 0 so the only HBM
    # writebacks are the real, lane-dense phase-1 chunks.
    out_spec = pl.BlockSpec((1, TL, E), lambda b, p, c: (b, p * c, 0))

    scratch_shapes = [
        pltpu.VMEM((E, E), f32),            # kv accumulator, sin branch
        pltpu.VMEM((E, E), f32),            # kv accumulator, cos branch
        pltpu.VMEM((1, E), f32),            # sum_l k*sin
        pltpu.VMEM((1, E), f32),            # sum_l k*cos
        pltpu.VMEM((E, num_heads), f32),    # lane -> head one-hot
        pltpu.VMEM((num_heads, E), f32),    # head -> lane one-hot
    ]

    return pl.pallas_call(
        kernel,
        out_shape=jax.ShapeDtypeStruct((B, L, E), jnp.float32),
        grid=(B, 2, n_chunks),
        in_specs=in_specs,
        out_specs=out_spec,
        scratch_shapes=scratch_shapes,
        compiler_params=pltpu.CompilerParams(
            # B shards across v7x's two TensorCores; phase/chunk provide deep pipelining on
            # the single-TC generations (v5e/v6e).
            dimension_semantics=("parallel", "arbitrary", "arbitrary"),
            vmem_limit_bytes=vmem_limit),
    )(x_c, wq, bq, wk, bk, wv, bv, wo, bo)


def cosformer_reference(x, params, *, num_heads, eps=1e-4):
    """Pure-JAX f32 reference matching the PyTorch forward semantics."""
    B, L, E = x.shape
    D = E // num_heads
    q = jax.nn.relu(x @ params["wq"] + params["bq"])
    k = jax.nn.relu(x @ params["wk"] + params["bk"])
    v = x @ params["wv"] + params["bv"]

    idx = (jnp.pi / 2.0) * jnp.arange(1, L + 1, dtype=jnp.float32) / float(L)
    s = jnp.sin(idx)[None, None, :, None]                    # (1,1,L,1)
    c = jnp.cos(idx)[None, None, :, None]

    qh = q.reshape(B, L, num_heads, D).transpose(0, 2, 1, 3)  # (B,H,L,D)
    kh = k.reshape(B, L, num_heads, D).transpose(0, 2, 1, 3)
    vh = v.reshape(B, L, num_heads, D).transpose(0, 2, 1, 3)

    q_ = jnp.concatenate([qh * s, qh * c], axis=-1)           # (B,H,L,2D)
    k_ = jnp.concatenate([kh * s, kh * c], axis=-1)

    kv = jnp.einsum("bhld,bhlm->bhdm", k_, vh)
    z = 1.0 / jnp.maximum(jnp.einsum("bhld,bhd->bhl", q_, k_.sum(axis=2)), eps)
    o = jnp.einsum("bhld,bhdm,bhl->bhlm", q_, kv, z)
    o = o.transpose(0, 2, 1, 3).reshape(B, L, E)
    return o @ params["wo"] + params["bo"]


if __name__ == "__main__":
    # Small shapes for the functional check. Real configs should use E a multiple of 128
    # (lane-dense output stores) and larger L to exercise the chunked pipeline properly.
    B, L, E, H = 2, 16, 32, 4   # batch, seq, d_model, n_heads (head_dim = 8)

    key = jax.random.PRNGKey(0)
    ks = jax.random.split(key, 9)
    params = {
        "wq": 0.1 * jax.random.normal(ks[0], (E, E), jnp.float32),
        "wk": 0.1 * jax.random.normal(ks[1], (E, E), jnp.float32),
        "wv": 0.1 * jax.random.normal(ks[2], (E, E), jnp.float32),
        "wo": 0.1 * jax.random.normal(ks[3], (E, E), jnp.float32),
        "bq": 0.05 * jax.random.normal(ks[4], (1, E), jnp.float32),
        "bk": 0.05 * jax.random.normal(ks[5], (1, E), jnp.float32),
        "bv": 0.05 * jax.random.normal(ks[6], (1, E), jnp.float32),
        "bo": 0.05 * jax.random.normal(ks[7], (1, E), jnp.float32),
    }
    x = jax.random.normal(ks[8], (B, L, E), jnp.float32)

    ref = cosformer_reference(x, params, num_heads=H)

    # f32 path with the two-phase L-chunking exercised (TL=8 -> 2 chunks per batch element).
    out = cosformer_attention(x, params, num_heads=H, max_chunk=8)
    out = jax.block_until_ready(out)
    assert out.shape == (B, L, E)
    assert jnp.all(jnp.isfinite(out))
    assert jnp.allclose(out, ref, atol=5e-3, rtol=5e-3), (
        f"max abs diff {jnp.max(jnp.abs(out - ref))}")

    # f32 path, single chunk (TL = L): exercises the n_chunks == 1 code path.
    out1 = cosformer_attention(x, params, num_heads=H)
    out1 = jax.block_until_ready(out1)
    assert jnp.allclose(out1, ref, atol=5e-3, rtol=5e-3), (
        f"max abs diff {jnp.max(jnp.abs(out1 - ref))}")

    # bf16 MXU-operand path (f32 accumulation), checked with a loose tolerance.
    out_bf = cosformer_attention(x, params, num_heads=H,
                                 compute_dtype=jnp.bfloat16, max_chunk=8)
    out_bf = jax.block_until_ready(out_bf)
    assert out_bf.shape == (B, L, E)
    assert jnp.all(jnp.isfinite(out_bf))
    assert jnp.allclose(out_bf, ref, atol=5e-2, rtol=5e-2), (
        f"max abs diff {jnp.max(jnp.abs(out_bf - ref))}")

    print("KERNEL_OK")
</pallas_src>

<mosaic_0001>
module attributes {stable_mosaic.version = 11 : i64} {
  func.func @_cosformer_kernel(%arg0: i32, %arg1: i32, %arg2: i32, %arg3: memref<1x8x32xf32, #tpu.memory_space<vmem>>, %arg4: memref<32x32xf32, #tpu.memory_space<vmem>>, %arg5: memref<1x32xf32, #tpu.memory_space<vmem>>, %arg6: memref<32x32xf32, #tpu.memory_space<vmem>>, %arg7: memref<1x32xf32, #tpu.memory_space<vmem>>, %arg8: memref<32x32xf32, #tpu.memory_space<vmem>>, %arg9: memref<1x32xf32, #tpu.memory_space<vmem>>, %arg10: memref<32x32xf32, #tpu.memory_space<vmem>>, %arg11: memref<1x32xf32, #tpu.memory_space<vmem>>, %arg12: memref<1x8x32xf32, #tpu.memory_space<vmem>>, %arg13: memref<32x32xf32, #tpu.memory_space<vmem>>, %arg14: memref<32x32xf32, #tpu.memory_space<vmem>>, %arg15: memref<1x32xf32, #tpu.memory_space<vmem>>, %arg16: memref<1x32xf32, #tpu.memory_space<vmem>>, %arg17: memref<32x4xf32, #tpu.memory_space<vmem>>, %arg18: memref<4x32xf32, #tpu.memory_space<vmem>>) attributes {dimension_semantics = [#tpu.dimension_semantics<parallel>, #tpu.dimension_semantics<arbitrary>, #tpu.dimension_semantics<arbitrary>], iteration_bounds = array<i64: 2, 2, 2>, scalar_prefetch = 0 : i64, scratch_operands = 6 : i64, tpu.core_type = #tpu.core_type<tc>, window_params = [{transform_indices = @transform_0, window_bounds = array<i64: 1, 8, 32>}, {pipeline_mode = #tpu.pipeline_mode<synchronous>, transform_indices = @transform_1, window_bounds = array<i64: 32, 32>}, {pipeline_mode = #tpu.pipeline_mode<synchronous>, transform_indices = @transform_2, window_bounds = array<i64: 1, 32>}, {pipeline_mode = #tpu.pipeline_mode<synchronous>, transform_indices = @transform_3, window_bounds = array<i64: 32, 32>}, {pipeline_mode = #tpu.pipeline_mode<synchronous>, transform_indices = @transform_4, window_bounds = array<i64: 1, 32>}, {pipeline_mode = #tpu.pipeline_mode<synchronous>, transform_indices = @transform_5, window_bounds = array<i64: 32, 32>}, {pipeline_mode = #tpu.pipeline_mode<synchronous>, transform_indices = @transform_6, window_bounds = array<i64: 1, 32>}, {pipeline_mode = #tpu.pipeline_mode<synchronous>, transform_indices = @transform_7, window_bounds = array<i64: 32, 32>}, {pipeline_mode = #tpu.pipeline_mode<synchronous>, transform_indices = @transform_8, window_bounds = array<i64: 1, 32>}, {transform_indices = @transform_9, window_bounds = array<i64: 1, 8, 32>}]} {
    %c0_i32 = arith.constant 0 : i32
    %0 = arith.cmpi eq, %arg1, %c0_i32 : i32
    %c0_i32_0 = arith.constant 0 : i32
    %1 = arith.cmpi eq, %arg2, %c0_i32_0 : i32
    %2 = arith.andi %0, %1 : i1
    %3 = arith.extui %2 : i1 to i32
    %c0_i32_1 = arith.constant 0 : i32
    %4 = arith.cmpi ne, %3, %c0_i32_1 : i32
    scf.if %4 {
      %cst_11 = arith.constant 0.000000e+00 : f32
      %29 = vector.broadcast %cst_11 : f32 to vector<32x32xf32>
      %c0_12 = arith.constant 0 : index
      %c0_13 = arith.constant 0 : index
      %30 = vector.load %arg13[%c0_12, %c0_13] : memref<32x32xf32, #tpu.memory_space<vmem>>, vector<32x32xf32>
      tpu.vector_store %arg13[%c0_12, %c0_13], %29 {strides = array<i32>} : memref<32x32xf32, #tpu.memory_space<vmem>>, vector<32x32xf32>,
      %cst_14 = arith.constant 0.000000e+00 : f32
      %31 = vector.broadcast %cst_14 : f32 to vector<32x32xf32>
      %c0_15 = arith.constant 0 : index
      %c0_16 = arith.constant 0 : index
      %32 = vector.load %arg14[%c0_15, %c0_16] : memref<32x32xf32, #tpu.memory_space<vmem>>, vector<32x32xf32>
      tpu.vector_store %arg14[%c0_15, %c0_16], %31 {strides = array<i32>} : memref<32x32xf32, #tpu.memory_space<vmem>>, vector<32x32xf32>,
      %cst_17 = arith.constant 0.000000e+00 : f32
      %33 = vector.broadcast %cst_17 : f32 to vector<1x32xf32>
      %c0_18 = arith.constant 0 : index
      %c0_19 = arith.constant 0 : index
      %34 = vector.load %arg15[%c0_18, %c0_19] : memref<1x32xf32, #tpu.memory_space<vmem>>, vector<1x32xf32>
      tpu.vector_store %arg15[%c0_18, %c0_19], %33 {strides = array<i32>} : memref<1x32xf32, #tpu.memory_space<vmem>>, vector<1x32xf32>,
      %cst_20 = arith.constant 0.000000e+00 : f32
      %35 = vector.broadcast %cst_20 : f32 to vector<1x32xf32>
      %c0_21 = arith.constant 0 : index
      %c0_22 = arith.constant 0 : index
      %36 = vector.load %arg16[%c0_21, %c0_22] : memref<1x32xf32, #tpu.memory_space<vmem>>, vector<1x32xf32>
      tpu.vector_store %arg16[%c0_21, %c0_22], %35 {strides = array<i32>} : memref<1x32xf32, #tpu.memory_space<vmem>>, vector<1x32xf32>,
      %37 = tpu.iota {dimensions = array<i32: 0>} : vector<32x4xi32>
      %38 = tpu.iota {dimensions = array<i32: 1>} : vector<32x4xi32>
      %c8_i32_23 = arith.constant 8 : i32
      %39 = vector.broadcast %c8_i32_23 : i32 to vector<32x4xi32>
      %40 = arith.muli %38, %39 : vector<32x4xi32>
      %41 = arith.cmpi sge, %37, %40 : vector<32x4xi32>
      %c1_i32_24 = arith.constant 1 : i32
      %42 = vector.broadcast %c1_i32_24 : i32 to vector<32x4xi32>
      %43 = arith.addi %38, %42 : vector<32x4xi32>
      %c8_i32_25 = arith.constant 8 : i32
      %44 = vector.broadcast %c8_i32_25 : i32 to vector<32x4xi32>
      %45 = arith.muli %43, %44 : vector<32x4xi32>
      %46 = arith.cmpi slt, %37, %45 : vector<32x4xi32>
      %47 = arith.andi %41, %46 : vector<32x4xi1>
      %48 = arith.extui %47 : vector<32x4xi1> to vector<32x4xi32>
      %49 = arith.sitofp %48 : vector<32x4xi32> to vector<32x4xf32>
      %c0_26 = arith.constant 0 : index
      %c0_27 = arith.constant 0 : index
      %50 = vector.load %arg17[%c0_26, %c0_27] : memref<32x4xf32, #tpu.memory_space<vmem>>, vector<32x4xf32>
      tpu.vector_store %arg17[%c0_26, %c0_27], %49 {strides = array<i32>} : memref<32x4xf32, #tpu.memory_space<vmem>>, vector<32x4xf32>,
      %51 = tpu.iota {dimensions = array<i32: 0>} : vector<4x32xi32>
      %52 = tpu.iota {dimensions = array<i32: 1>} : vector<4x32xi32>
      %c8_i32_28 = arith.constant 8 : i32
      %53 = vector.broadcast %c8_i32_28 : i32 to vector<4x32xi32>
      %54 = arith.muli %51, %53 : vector<4x32xi32>
      %55 = arith.cmpi sge, %52, %54 : vector<4x32xi32>
      %c1_i32_29 = arith.constant 1 : i32
      %56 = vector.broadcast %c1_i32_29 : i32 to vector<4x32xi32>
      %57 = arith.addi %51, %56 : vector<4x32xi32>
      %c8_i32_30 = arith.constant 8 : i32
      %58 = vector.broadcast %c8_i32_30 : i32 to vector<4x32xi32>
      %59 = arith.muli %57, %58 : vector<4x32xi32>
      %60 = arith.cmpi slt, %52, %59 : vector<4x32xi32>
      %61 = arith.andi %55, %60 : vector<4x32xi1>
      %62 = arith.extui %61 : vector<4x32xi1> to vector<4x32xi32>
      %63 = arith.sitofp %62 : vector<4x32xi32> to vector<4x32xf32>
      %c0_31 = arith.constant 0 : index
      %c0_32 = arith.constant 0 : index
      %64 = vector.load %arg18[%c0_31, %c0_32] : memref<4x32xf32, #tpu.memory_space<vmem>>, vector<4x32xf32>
      tpu.vector_store %arg18[%c0_31, %c0_32], %63 {strides = array<i32>} : memref<4x32xf32, #tpu.memory_space<vmem>>, vector<4x32xf32>,
    } else {
    }
    %c0 = arith.constant 0 : index
    %c0_2 = arith.constant 0 : index
    %c0_3 = arith.constant 0 : index
    %5 = vector.load %arg3[%c0, %c0_2, %c0_3] : memref<1x8x32xf32, #tpu.memory_space<vmem>>, vector<1x8x32xf32>
    %6 = vector.shape_cast %5 : vector<1x8x32xf32> to vector<8x32xf32>
    %7 = tpu.iota {dimensions = array<i32: 0>} : vector<8x1xi32>
    %c8_i32 = arith.constant 8 : i32
    %8 = arith.muli %arg2, %c8_i32 : i32
    %9 = vector.broadcast %8 : i32 to vector<8x1xi32>
    %10 = arith.addi %7, %9 : vector<8x1xi32>
    %c1_i32 = arith.constant 1 : i32
    %11 = vector.broadcast %c1_i32 : i32 to vector<8x1xi32>
    %12 = arith.addi %10, %11 : vector<8x1xi32>
    %13 = arith.sitofp %12 : vector<8x1xi32> to vector<8x1xf32>
    %cst = arith.constant 0.0981747731 : f32
    %14 = vector.broadcast %cst : f32 to vector<8x1xf32>
    %15 = arith.mulf %13, %14 : vector<8x1xf32>
    %16 = math.sin %15 : vector<8x1xf32>
    %17 = math.cos %15 : vector<8x1xf32>
    %c0_i32_4 = arith.constant 0 : i32
    %18 = arith.cmpi eq, %arg1, %c0_i32_4 : i32
    %19 = arith.extui %18 : i1 to i32
    %c0_i32_5 = arith.constant 0 : i32
    %20 = arith.cmpi ne, %19, %c0_i32_5 : i32
    scf.if %20 {
      %c0_11 = arith.constant 0 : index
      %c0_12 = arith.constant 0 : index
      %29 = vector.load %arg6[%c0_11, %c0_12] : memref<32x32xf32, #tpu.memory_space<vmem>>, vector<32x32xf32>
      %cst_13 = arith.constant dense<0.000000e+00> : vector<8x32xf32>
      %30 = tpu.matmul %6, %29, %cst_13 {dimension_numbers = #tpu.dot_dimension_numbers<[1], [0], [0], [1], [0, 0, 1, 1], [], []>} : vector<8x32xf32>, vector<32x32xf32>, vector<8x32xf32> -> vector<8x32xf32>
      %c0_14 = arith.constant 0 : index
      %c0_15 = arith.constant 0 : index
      %31 = vector.load %arg7[%c0_14, %c0_15] : memref<1x32xf32, #tpu.memory_space<vmem>>, vector<1x32xf32>
      %32 = vector.broadcast %31 : vector<1x32xf32> to vector<8x32xf32>
      %33 = arith.addf %30, %32 : vector<8x32xf32>
      %cst_16 = arith.constant 0.000000e+00 : f32
      %34 = vector.broadcast %cst_16 : f32 to vector<8x32xf32>
      %35 = arith.maximumf %33, %34 : vector<8x32xf32>
      %c0_17 = arith.constant 0 : index
      %c0_18 = arith.constant 0 : index
      %36 = vector.load %arg8[%c0_17, %c0_18] : memref<32x32xf32, #tpu.memory_space<vmem>>, vector<32x32xf32>
      %cst_19 = arith.constant dense<0.000000e+00> : vector<8x32xf32>
      %37 = tpu.matmul %6, %36, %cst_19 {dimension_numbers = #tpu.dot_dimension_numbers<[1], [0], [0], [1], [0, 0, 1, 1], [], []>} : vector<8x32xf32>, vector<32x32xf32>, vector<8x32xf32> -> vector<8x32xf32>
      %c0_20 = arith.constant 0 : index
      %c0_21 = arith.constant 0 : index
      %38 = vector.load %arg9[%c0_20, %c0_21] : memref<1x32xf32, #tpu.memory_space<vmem>>, vector<1x32xf32>
      %39 = vector.broadcast %38 : vector<1x32xf32> to vector<8x32xf32>
      %40 = arith.addf %37, %39 : vector<8x32xf32>
      %41 = vector.broadcast %16 : vector<8x1xf32> to vector<8x32xf32>
      %42 = arith.mulf %35, %41 : vector<8x32xf32>
      %43 = vector.broadcast %17 : vector<8x1xf32> to vector<8x32xf32>
      %44 = arith.mulf %35, %43 : vector<8x32xf32>
      %c0_22 = arith.constant 0 : index
      %c0_23 = arith.constant 0 : index
      %45 = vector.load %arg13[%c0_22, %c0_23] : memref<32x32xf32, #tpu.memory_space<vmem>>, vector<32x32xf32>
      %cst_24 = arith.constant dense<0.000000e+00> : vector<32x32xf32>
      %46 = tpu.matmul %42, %40, %cst_24 {dimension_numbers = #tpu.dot_dimension_numbers<[0], [0], [1], [1], [0, 1, 1, 1], [], []>} : vector<8x32xf32>, vector<8x32xf32>, vector<32x32xf32> -> vector<32x32xf32>
      %47 = arith.addf %45, %46 : vector<32x32xf32>
      %c0_25 = arith.constant 0 : index
      %c0_26 = arith.constant 0 : index
      %48 = vector.load %arg13[%c0_25, %c0_26] : memref<32x32xf32, #tpu.memory_space<vmem>>, vector<32x32xf32>
      tpu.vector_store %arg13[%c0_25, %c0_26], %47 {strides = array<i32>} : memref<32x32xf32, #tpu.memory_space<vmem>>, vector<32x32xf32>,
      %c0_27 = arith.constant 0 : index
      %c0_28 = arith.constant 0 : index
      %49 = vector.load %arg14[%c0_27, %c0_28] : memref<32x32xf32, #tpu.memory_space<vmem>>, vector<32x32xf32>
      %cst_29 = arith.constant dense<0.000000e+00> : vector<32x32xf32>
      %50 = tpu.matmul %44, %40, %cst_29 {dimension_numbers = #tpu.dot_dimension_numbers<[0], [0], [1], [1], [0, 1, 1, 1], [], []>} : vector<8x32xf32>, vector<8x32xf32>, vector<32x32xf32> -> vector<32x32xf32>
      %51 = arith.addf %49, %50 : vector<32x32xf32>
      %c0_30 = arith.constant 0 : index
      %c0_31 = arith.constant 0 : index
      %52 = vector.load %arg14[%c0_30, %c0_31] : memref<32x32xf32, #tpu.memory_space<vmem>>, vector<32x32xf32>
      tpu.vector_store %arg14[%c0_30, %c0_31], %51 {strides = array<i32>} : memref<32x32xf32, #tpu.memory_space<vmem>>, vector<32x32xf32>,
      %c0_32 = arith.constant 0 : index
      %c0_33 = arith.constant 0 : index
      %53 = vector.load %arg15[%c0_32, %c0_33] : memref<1x32xf32, #tpu.memory_space<vmem>>, vector<1x32xf32>
      %cst_34 = arith.constant dense<0.000000e+00> : vector<32xf32>
      %54 = vector.multi_reduction <add>, %42, %cst_34 [0] : vector<8x32xf32> to vector<32xf32>
      %55 = vector.shape_cast %54 : vector<32xf32> to vector<1x32xf32>
      %56 = arith.addf %53, %55 : vector<1x32xf32>
      %c0_35 = arith.constant 0 : index
      %c0_36 = arith.constant 0 : index
      %57 = vector.load %arg15[%c0_35, %c0_36] : memref<1x32xf32, #tpu.memory_space<vmem>>, vector<1x32xf32>
      tpu.vector_store %arg15[%c0_35, %c0_36], %56 {strides = array<i32>} : memref<1x32xf32, #tpu.memory_space<vmem>>, vector<1x32xf32>,
      %c0_37 = arith.constant 0 : index
      %c0_38 = arith.constant 0 : index
      %58 = vector.load %arg16[%c0_37, %c0_38] : memref<1x32xf32, #tpu.memory_space<vmem>>, vector<1x32xf32>
      %cst_39 = arith.constant dense<0.000000e+00> : vector<32xf32>
      %59 = vector.multi_reduction <add>, %44, %cst_39 [0] : vector<8x32xf32> to vector<32xf32>
      %60 = vector.shape_cast %59 : vector<32xf32> to vector<1x32xf32>
      %61 = arith.addf %58, %60 : vector<1x32xf32>
      %c0_40 = arith.constant 0 : index
      %c0_41 = arith.constant 0 : index
      %62 = vector.load %arg16[%c0_40, %c0_41] : memref<1x32xf32, #tpu.memory_space<vmem>>, vector<1x32xf32>
      tpu.vector_store %arg16[%c0_40, %c0_41], %61 {strides = array<i32>} : memref<1x32xf32, #tpu.memory_space<vmem>>, vector<1x32xf32>,
    } else {
    }
    %c0_i32_6 = arith.constant 0 : i32
    %21 = arith.cmpi eq, %arg1, %c0_i32_6 : i32
    %c1_i32_7 = arith.constant 1 : i32
    %22 = arith.cmpi eq, %arg2, %c1_i32_7 : i32
    %23 = arith.andi %21, %22 : i1
    %24 = arith.extui %23 : i1 to i32
    %c0_i32_8 = arith.constant 0 : i32
    %25 = arith.cmpi ne, %24, %c0_i32_8 : i32
    scf.if %25 {
      %c0_11 = arith.constant 0 : index
      %c0_12 = arith.constant 0 : index
      %29 = vector.load %arg17[%c0_11, %c0_12] : memref<32x4xf32, #tpu.memory_space<vmem>>, vector<32x4xf32>
      %c0_13 = arith.constant 0 : index
      %c0_14 = arith.constant 0 : index
      %30 = vector.load %arg18[%c0_13, %c0_14] : memref<4x32xf32, #tpu.memory_space<vmem>>, vector<4x32xf32>
      %cst_15 = arith.constant dense<0.000000e+00> : vector<32x32xf32>
      %31 = tpu.matmul %29, %30, %cst_15 {dimension_numbers = #tpu.dot_dimension_numbers<[1], [0], [0], [1], [0, 0, 1, 1], [], []>} : vector<32x4xf32>, vector<4x32xf32>, vector<32x32xf32> -> vector<32x32xf32>
      %c0_16 = arith.constant 0 : index
      %c0_17 = arith.constant 0 : index
      %32 = vector.load %arg13[%c0_16, %c0_17] : memref<32x32xf32, #tpu.memory_space<vmem>>, vector<32x32xf32>
      %33 = arith.mulf %32, %31 : vector<32x32xf32>
      %c0_18 = arith.constant 0 : index
      %c0_19 = arith.constant 0 : index
      %34 = vector.load %arg13[%c0_18, %c0_19] : memref<32x32xf32, #tpu.memory_space<vmem>>, vector<32x32xf32>
      tpu.vector_store %arg13[%c0_18, %c0_19], %33 {strides = array<i32>} : memref<32x32xf32, #tpu.memory_space<vmem>>, vector<32x32xf32>,
      %c0_20 = arith.constant 0 : index
      %c0_21 = arith.constant 0 : index
      %35 = vector.load %arg14[%c0_20, %c0_21] : memref<32x32xf32, #tpu.memory_space<vmem>>, vector<32x32xf32>
      %36 = arith.mulf %35, %31 : vector<32x32xf32>
      %c0_22 = arith.constant 0 : index
      %c0_23 = arith.constant 0 : index
      %37 = vector.load %arg14[%c0_22, %c0_23] : memref<32x32xf32, #tpu.memory_space<vmem>>, vector<32x32xf32>
      tpu.vector_store %arg14[%c0_22, %c0_23], %36 {strides = array<i32>} : memref<32x32xf32, #tpu.memory_space<vmem>>, vector<32x32xf32>,
    } else {
    }
    %c1_i32_9 = arith.constant 1 : i32
    %26 = arith.cmpi eq, %arg1, %c1_i32_9 : i32
    %27 = arith.extui %26 : i1 to i32
    %c0_i32_10 = arith.constant 0 : i32
    %28 = arith.cmpi ne, %27, %c0_i32_10 : i32
    scf.if %28 {
      %c0_11 = arith.constant 0 : index
      %c0_12 = arith.constant 0 : index
      %29 = vector.load %arg4[%c0_11, %c0_12] : memref<32x32xf32, #tpu.memory_space<vmem>>, vector<32x32xf32>
      %cst_13 = arith.constant dense<0.000000e+00> : vector<8x32xf32>
      %30 = tpu.matmul %6, %29, %cst_13 {dimension_numbers = #tpu.dot_dimension_numbers<[1], [0], [0], [1], [0, 0, 1, 1], [], []>} : vector<8x32xf32>, vector<32x32xf32>, vector<8x32xf32> -> vector<8x32xf32>
      %c0_14 = arith.constant 0 : index
      %c0_15 = arith.constant 0 : index
      %31 = vector.load %arg5[%c0_14, %c0_15] : memref<1x32xf32, #tpu.memory_space<vmem>>, vector<1x32xf32>
      %32 = vector.broadcast %31 : vector<1x32xf32> to vector<8x32xf32>
      %33 = arith.addf %30, %32 : vector<8x32xf32>
      %cst_16 = arith.constant 0.000000e+00 : f32
      %34 = vector.broadcast %cst_16 : f32 to vector<8x32xf32>
      %35 = arith.maximumf %33, %34 : vector<8x32xf32>
      %36 = vector.broadcast %16 : vector<8x1xf32> to vector<8x32xf32>
      %37 = arith.mulf %35, %36 : vector<8x32xf32>
      %38 = vector.broadcast %17 : vector<8x1xf32> to vector<8x32xf32>
      %39 = arith.mulf %35, %38 : vector<8x32xf32>
      %c0_17 = arith.constant 0 : index
      %c0_18 = arith.constant 0 : index
      %40 = vector.load %arg13[%c0_17, %c0_18] : memref<32x32xf32, #tpu.memory_space<vmem>>, vector<32x32xf32>
      %cst_19 = arith.constant dense<0.000000e+00> : vector<8x32xf32>
      %41 = tpu.matmul %37, %40, %cst_19 {dimension_numbers = #tpu.dot_dimension_numbers<[1], [0], [0], [1], [0, 0, 1, 1], [], []>} : vector<8x32xf32>, vector<32x32xf32>, vector<8x32xf32> -> vector<8x32xf32>
      %c0_20 = arith.constant 0 : index
      %c0_21 = arith.constant 0 : index
      %42 = vector.load %arg14[%c0_20, %c0_21] : memref<32x32xf32, #tpu.memory_space<vmem>>, vector<32x32xf32>
      %cst_22 = arith.constant dense<0.000000e+00> : vector<8x32xf32>
      %43 = tpu.matmul %39, %42, %cst_22 {dimension_numbers = #tpu.dot_dimension_numbers<[1], [0], [0], [1], [0, 0, 1, 1], [], []>} : vector<8x32xf32>, vector<32x32xf32>, vector<8x32xf32> -> vector<8x32xf32>
      %44 = arith.addf %41, %43 : vector<8x32xf32>
      %c0_23 = arith.constant 0 : index
      %c0_24 = arith.constant 0 : index
      %45 = vector.load %arg15[%c0_23, %c0_24] : memref<1x32xf32, #tpu.memory_space<vmem>>, vector<1x32xf32>
      %46 = vector.broadcast %45 : vector<1x32xf32> to vector<8x32xf32>
      %47 = arith.mulf %37, %46 : vector<8x32xf32>
      %c0_25 = arith.constant 0 : index
      %c0_26 = arith.constant 0 : index
      %48 = vector.load %arg16[%c0_25, %c0_26] : memref<1x32xf32, #tpu.memory_space<vmem>>, vector<1x32xf32>
      %49 = vector.broadcast %48 : vector<1x32xf32> to vector<8x32xf32>
      %50 = arith.mulf %39, %49 : vector<8x32xf32>
      %51 = arith.addf %47, %50 : vector<8x32xf32>
      %c0_27 = arith.constant 0 : index
      %c0_28 = arith.constant 0 : index
      %52 = vector.load %arg17[%c0_27, %c0_28] : memref<32x4xf32, #tpu.memory_space<vmem>>, vector<32x4xf32>
      %cst_29 = arith.constant dense<0.000000e+00> : vector<8x4xf32>
      %53 = tpu.matmul %51, %52, %cst_29 {dimension_numbers = #tpu.dot_dimension_numbers<[1], [0], [0], [1], [0, 0, 1, 1], [], []>} : vector<8x32xf32>, vector<32x4xf32>, vector<8x4xf32> -> vector<8x4xf32>
      %c0_30 = arith.constant 0 : index
      %c0_31 = arith.constant 0 : index
      %54 = vector.load %arg18[%c0_30, %c0_31] : memref<4x32xf32, #tpu.memory_space<vmem>>, vector<4x32xf32>
      %cst_32 = arith.constant dense<0.000000e+00> : vector<8x32xf32>
      %55 = tpu.matmul %53, %54, %cst_32 {dimension_numbers = #tpu.dot_dimension_numbers<[1], [0], [0], [1], [0, 0, 1, 1], [], []>} : vector<8x4xf32>, vector<4x32xf32>, vector<8x32xf32> -> vector<8x32xf32>
      %cst_33 = arith.constant 9.99999974E-5 : f32
      %56 = vector.broadcast %cst_33 : f32 to vector<8x32xf32>
      %57 = arith.maximumf %55, %56 : vector<8x32xf32>
      %cst_34 = arith.constant 1.000000e+00 : f32
      %58 = vector.broadcast %cst_34 : f32 to vector<8x32xf32>
      %59 = arith.divf %58, %57 : vector<8x32xf32>
      %60 = arith.mulf %44, %59 : vector<8x32xf32>
      %c0_35 = arith.constant 0 : index
      %c0_36 = arith.constant 0 : index
      %61 = vector.load %arg10[%c0_35, %c0_36] : memref<32x32xf32, #tpu.memory_space<vmem>>, vector<32x32xf32>
      %cst_37 = arith.constant dense<0.000000e+00> : vector<8x32xf32>
      %62 = tpu.matmul %60, %61, %cst_37 {dimension_numbers = #tpu.dot_dimension_numbers<[1], [0], [0], [1], [0, 0, 1, 1], [], []>} : vector<8x32xf32>, vector<32x32xf32>, vector<8x32xf32> -> vector<8x32xf32>
      %c0_38 = arith.constant 0 : index
      %c0_39 = arith.constant 0 : index
      %63 = vector.load %arg11[%c0_38, %c0_39] : memref<1x32xf32, #tpu.memory_space<vmem>>, vector<1x32xf32>
      %64 = vector.broadcast %63 : vector<1x32xf32> to vector<8x32xf32>
      %65 = arith.addf %62, %64 : vector<8x32xf32>
      %c0_40 = arith.constant 0 : index
      %c0_41 = arith.constant 0 : index
      %c0_42 = arith.constant 0 : index
      %66 = vector.load %arg12[%c0_40, %c0_41, %c0_42] : memref<1x8x32xf32, #tpu.memory_space<vmem>>, vector<1x8x32xf32>
      %67 = vector.shape_cast %66 : vector<1x8x32xf32> to vector<8x32xf32>
      %68 = vector.shape_cast %65 : vector<8x32xf32> to vector<1x8x32xf32>
      tpu.vector_store %arg12[%c0_40, %c0_41, %c0_42], %68 {strides = array<i32>} : memref<1x8x32xf32, #tpu.memory_space<vmem>>, vector<1x8x32xf32>,
    } else {
    }
    return
  }
  func.func @transform_0(%arg0: i32, %arg1: i32, %arg2: i32) -> (i32, i32, i32) {
    %c0_i32 = arith.constant 0 : i32
    %c0_i32_0 = arith.constant 0 : i32
    return %arg0, %arg2, %c0_i32 : i32, i32, i32
  }
  func.func @transform_1(%arg0: i32, %arg1: i32, %arg2: i32) -> (i32, i32) {
    %c0_i32 = arith.constant 0 : i32
    %c0_i32_0 = arith.constant 0 : i32
    %c0_i32_1 = arith.constant 0 : i32
    return %c0_i32, %c0_i32_0 : i32, i32
  }
  func.func @transform_2(%arg0: i32, %arg1: i32, %arg2: i32) -> (i32, i32) {
    %c0_i32 = arith.constant 0 : i32
    %c0_i32_0 = arith.constant 0 : i32
    %c0_i32_1 = arith.constant 0 : i32
    return %c0_i32, %c0_i32_0 : i32, i32
  }
  func.func @transform_3(%arg0: i32, %arg1: i32, %arg2: i32) -> (i32, i32) {
    %c0_i32 = arith.constant 0 : i32
    %c0_i32_0 = arith.constant 0 : i32
    %c0_i32_1 = arith.constant 0 : i32
    return %c0_i32, %c0_i32_0 : i32, i32
  }
  func.func @transform_4(%arg0: i32, %arg1: i32, %arg2: i32) -> (i32, i32) {
    %c0_i32 = arith.constant 0 : i32
    %c0_i32_0 = arith.constant 0 : i32
    %c0_i32_1 = arith.constant 0 : i32
    return %c0_i32, %c0_i32_0 : i32, i32
  }
  func.func @transform_5(%arg0: i32, %arg1: i32, %arg2: i32) -> (i32, i32) {
    %c0_i32 = arith.constant 0 : i32
    %c0_i32_0 = arith.constant 0 : i32
    %c0_i32_1 = arith.constant 0 : i32
    return %c0_i32, %c0_i32_0 : i32, i32
  }
  func.func @transform_6(%arg0: i32, %arg1: i32, %arg2: i32) -> (i32, i32) {
    %c0_i32 = arith.constant 0 : i32
    %c0_i32_0 = arith.constant 0 : i32
    %c0_i32_1 = arith.constant 0 : i32
    return %c0_i32, %c0_i32_0 : i32, i32
  }
  func.func @transform_7(%arg0: i32, %arg1: i32, %arg2: i32) -> (i32, i32) {
    %c0_i32 = arith.constant 0 : i32
    %c0_i32_0 = arith.constant 0 : i32
    %c0_i32_1 = arith.constant 0 : i32
    return %c0_i32, %c0_i32_0 : i32, i32
  }
  func.func @transform_8(%arg0: i32, %arg1: i32, %arg2: i32) -> (i32, i32) {
    %c0_i32 = arith.constant 0 : i32
    %c0_i32_0 = arith.constant 0 : i32
    %c0_i32_1 = arith.constant 0 : i32
    return %c0_i32, %c0_i32_0 : i32, i32
  }
  func.func @transform_9(%arg0: i32, %arg1: i32, %arg2: i32) -> (i32, i32, i32) {
    %0 = arith.muli %arg1, %arg2 : i32
    %c0_i32 = arith.constant 0 : i32
    %c0_i32_0 = arith.constant 0 : i32
    return %arg0, %0, %c0_i32 : i32, i32, i32
  }
}

</mosaic_0001>

<bundles_post_ra>
// kernel: tpu_custom_call.1
= control target key start
LH: loop header
LB: loop body
LE: loop exit
PB: predicated region body
PF: predicated region fallthrough
CT: control target
= control target key end

     0   :  { %s3291_s0 = inlined_call_operand.hbm [shape: f32[2,16,32], index: 0, kind: input, shape index: {}]   ;;  %s3292_s1 = inlined_call_operand.hbm [shape: f32[32,32], index: 1, kind: input, shape index: {}]   ;;  %s3293_s2 = inlined_call_operand.vmem [shape: f32[1,32], index: 2, kind: input, shape index: {}]   ;;  %s3294_s3 = inlined_call_operand.hbm [shape: f32[32,32], index: 3, kind: input, shape index: {}]   ;;  %s3295_s4 = inlined_call_operand.vmem [shape: f32[1,32], index: 4, kind: input, shape index: {}]   ;;  %s3296_s5 = inlined_call_operand.hbm [shape: f32[32,32], index: 5, kind: input, shape index: {}]   ;;  %s3297_s6 = inlined_call_operand.vmem [shape: f32[1,32], index: 6, kind: input, shape index: {}]   ;;  %s3298_s7 = inlined_call_operand.hbm [shape: f32[32,32], index: 7, kind: input, shape index: {}]   ;;  %s3299_s8 = inlined_call_operand.vmem [shape: f32[1,32], index: 8, kind: input, shape index: {}]   ;;  %s3300_s9 = inlined_call_operand.hbm [shape: f32[2,16,32], index: 9, kind: output, shape index: {}]  }
   0x1   :  { %3316 = sst [smem:[#allocation32_spill]] %s3292_s1 }
   0x2   :  { %3317 = sst [smem:[#allocation33_spill]] %s3293_s2 }
   0x3   :  { %3318 = sst [smem:[#allocation34_spill]] %s3294_s3 }
   0x4   :  { %3319 = sst [smem:[#allocation35_spill]] %s3295_s4 }
   0x5   :  { %3320 = sst [smem:[#allocation36_spill]] %s3296_s5 }
   0x6   :  { %3321 = sst [smem:[#allocation37_spill]] %s3297_s6 }
   0x7   :  { %3322 = sst [smem:[#allocation38_spill]] %s3298_s7 }
   0x8   :  { %3323 = sst [smem:[#allocation39_spill]] %s3299_s8 }
   0x9   :  { %3324 = sst [smem:[#allocation40_spill]] %s3300_s9 }
   0xa   :  { %14 = vsyncpa [#allocation9], 0 }
   0xb   :  { %16 = vsyncpa [#allocation9 + $0x1], 0 }
   0xc   :  { %17 = vsyncpa [#allocation12], 0 }
   0xd   :  { %18 = vsyncpa [#allocation15], 0 }
   0xe   :  { %19 = vsyncpa [#allocation10], 0 }
   0xf   :  { %21 = vsyncpa [#allocation10 + $0x1], 0  ;;  %s2796_s30 = smov 0   ;;  %s2798_s10 = smov 0  }
  0x10   :  { %s2800_s11 = smov 0   ;;  %s2802_s12 = smov 0  }
  0x11   :  { %s2804_s13 = smov 0   ;;  %s2806_s14 = smov 0  }
  0x12   :  { %s2808_s15 = smov 0   ;;  %s2810_s16 = smov 0  }
  0x13   :  { %s2812_s17 = smov 0   ;;  %s2814_s18 = smov 0  }
  0x14   :  { %s2816_s19 = smov 0   ;;  %s2818_s20 = smov 0  }
  0x15   :  { %s2820_s21 = smov 0  }
  0x16 LB: > { %3325 = sst [smem:[#allocation22_spill]] %s2675_s30  ;;  %s1980_s22 = sadd.s32 4294967295, %s2723_s21   ;;  %s2723_s21 = sphi %s2820_s21, %s27_s21   ;;  %s2719_s20 = sphi %s2818_s20, %s3391_s20   ;;  %s2715_s19 = sphi %s2816_s19, %s3390_s19   ;;  %s2711_s18 = sphi %s2814_s18, %s3389_s18   ;;  %s2707_s17 = sphi %s2812_s17, %s3388_s17   ;;  %s2703_s16 = sphi %s2810_s16, %s3387_s16   ;;  %s2699_s15 = sphi %s2808_s15, %s3386_s15   ;;  %s2695_s14 = sphi %s2806_s14, %s3385_s14   ;;  %s2691_s13 = sphi %s2804_s13, %s3384_s13   ;;  %s2687_s12 = sphi %s2802_s12, %s3383_s12   ;;  %s2683_s11 = sphi %s2800_s11, %s3382_s11   ;;  %s2679_s10 = sphi %s2798_s10, %s3381_s10   ;;  %s2675_s30 = sphi %s2796_s30, %s3380_s30  }
  0x17   : > { %3326 = sst [smem:[#allocation23_spill]] %s2679_s10  ;;  %s1981_s23 = sadd.s32 4294967294, %s2723_s21  }
  0x18   : > { %3327 = sst [smem:[#allocation24_spill]] %s2699_s15  ;;  %p2863_p0 = scmp.eq.s32.totalorder %s1980_s22, 0 }
  0x19   : > { %3328 = sst [smem:[#allocation25_spill]] %s2703_s16  ;;  %p263_p1 = scmp.ne.s32.totalorder %s2683_s11, %s2679_s10 }
  0x1a   : > { %3329 = sst [smem:[#allocation26_spill]] %s2707_s17  ;;  %p264_p2 = scmp.eq.s32.totalorder %s1980_s22, 7 }
  0x1b   : > { %s3330_s24 = scalar_select %p2863_p0, 1, 0 }
  0x1c   : > { %p269_p3 = scmp.ne.s32.totalorder %s2679_s10, %s2675_s30  ;;  %p270_p4 = scmp.eq.s32.totalorder %s1981_s23, 7 }
  0x1d   : > { %p1982_p5 = scmp.ge.s32.totalorder %s2723_s21, 1  ;;  %p2872_p6 = por %p264_p2, %p263_p1 }
  0x1e   : > { %p277_p7 = scmp.lt.s32.totalorder %s2723_s21, 9  ;;  %p2877_p8 = por %p270_p4, %p269_p3 }
  0x1f   : > { %s3331_s25 = scalar_select %p2872_p6, 1, 0 }
  0x20   : > { %s3333_s26 = scalar_select %p2877_p8, 1, 0 }
  0x21   : > { %3332 = sst [smem:[#allocation27_spill]] %s3331_s25  ;;  %p2881_p9 = pnand %p1982_p5, %p277_p7 }
  0x22   : > { %3334 = sst [smem:[#allocation28_spill]] %s3333_s26  ;;  %s2725_s28 = smov [#allocation11]  }
  0x23   : > { %s3335_s27 = scalar_select %p2881_p9, 1, 0 }
  0x24   : > { %s289_s29 = sshll.u32 %s2725_s28, 4  ;;  %p2275_p10 = pneg %p2881_p9  ;;  %s290_s29 = int_to_ptr.vmem [resolvable:$true] %s289_s29 }
  0x25   : > { %s2726_s23 = smov [#allocation14]   ;;  %s3337_s1 = sld [smem:[#allocation32_spill]] }
  0x26   : > { %p2889_p11 = pnand %p2275_p10, %p2863_p0  ;;  %s321_s30 = sshll.u32 %s2726_s23, 4  ;;  %s2893_s30 = int_to_ptr.vmem [resolvable:$true] %s321_s30 }
  0x28   : > { %p2903_p13 = pneg %p2889_p11 }
  0x2b   : > { %s2435_s25 = scalar_lea.hbm %s3337_s1, 512 }
  0x2c   : > { %p2436_p12 = scmp.ne.s32.totalorder %s3337_s1, %s2435_s25  ;;  %p2442_p3 = scmp.lt.u32.totalorder %s2435_s25, %s3337_s1 }
  0x2e   : > { %p2438_p1 = pnand %p2903_p13, %p2436_p12 }
  0x30   : > { %p2439_p2 = pneg %p2438_p1 }
  0x32   : > { %p2444_p4 = pnand %p2442_p3, %p2439_p2 }
  0x34   : > { %2447 = shalt.err (!%p2444_p4)
}
  0x35   : > { %s2448_s9 = scalar_lea.vmem %s290_s29, 512  ;;  %p2456_p8 = scmp.lt.s32.totalorder %s290_s29, %s290_s29 }
  0x36   : > { %p2449_p5 = scmp.ne.s32.totalorder %s290_s29, %s2448_s9  ;;  %p2457_p6 = scmp.lt.s32.totalorder %s2448_s9, %s2448_s9 }
  0x38   : > { %p2451_p7 = pnand %p2449_p5, %p2903_p13  ;;  %p2458_p9 = por %p2457_p6, %p2456_p8 }
  0x3a   : > { %p2452_p10 = pneg %p2451_p7 }
  0x3c   : > { %p2459_p0 = pnand %p2458_p9, %p2452_p10 }
  0x3e   : > { %2462 = shalt.err (!%p2459_p0)
}
  0x3f   : > { %s2727_s8 = smov 128   ;;  %s2728_s17 = smov 8  }
  0x40   : > { %2278 = dma.hbm_to_vmem [thread:$0]  (!%p2889_p11), %s3337_s1, 512, %s290_s29, [#allocation12], %s2727_s8, %s2727_s8, %s2728_s17  }
  0x41   : > { %s3339_s5 = sld [smem:[#allocation36_spill]] }
  0x47   : > { %s2463_s6 = scalar_lea.hbm %s3339_s5, 512 }
  0x48   : > { %p2464_p0 = scmp.ne.s32.totalorder %s3339_s5, %s2463_s6  ;;  %p2470_p9 = scmp.lt.u32.totalorder %s2463_s6, %s3339_s5 }
  0x4a   : > { %p2466_p6 = pnand %p2464_p0, %p2903_p13 }
  0x4c   : > { %p2467_p8 = pneg %p2466_p6 }
  0x4e   : > { %p2472_p12 = pnand %p2470_p9, %p2467_p8 }
  0x50   : > { %2475 = shalt.err (!%p2472_p12)
}
  0x51   : > { %s2476_s29 = scalar_lea.vmem %s2893_s30, 512  ;;  %p2484_p4 = scmp.lt.s32.totalorder %s2893_s30, %s2893_s30 }
  0x52   : > { %p2477_p1 = scmp.ne.s32.totalorder %s2893_s30, %s2476_s29  ;;  %p2485_p5 = scmp.lt.s32.totalorder %s2476_s29, %s2476_s29 }
  0x54   : > { %p2479_p2 = pnand %p2477_p1, %p2903_p13  ;;  %p2486_p7 = por %p2485_p5, %p2484_p4 }
  0x56   : > { %p2480_p3 = pneg %p2479_p2 }
  0x58   : > { %p2487_p10 = pnand %p2486_p7, %p2480_p3 }
  0x5a   : > { %2490 = shalt.err (!%p2487_p10)
}
  0x5b   : > { %2284 = dma.hbm_to_vmem [thread:$0]  (!%p2889_p11), %s3339_s5, 512, %s2893_s30, [#allocation15], %s2727_s8, %s2727_s8, %s2728_s17  }
  0x5c   : > { %s2729_s15 = smov [#allocation13]   ;;  %s2730_s2 = smov [#allocation16]  }
  0x5d   : > { %s305_s16 = sshll.u32 %s2729_s15, 4  ;;  %s337_s25 = sshll.u32 %s2730_s2, 4  ;;  %s306_s16 = int_to_ptr.vmem [resolvable:$true] %s305_s16  ;;  %s338_s25 = int_to_ptr.vmem [resolvable:$true] %s337_s25 }
  0x5e   : > { %s3340_s3 = sld [smem:[#allocation34_spill]] }
  0x64   : > { %s2491_s9 = scalar_lea.hbm %s3340_s3, 512 }
  0x65   : > { %p2492_p0 = scmp.ne.s32.totalorder %s3340_s3, %s2491_s9  ;;  %p2498_p9 = scmp.lt.u32.totalorder %s2491_s9, %s3340_s3 }
  0x67   : > { %p2494_p6 = pnand %p2492_p0, %p2903_p13 }
  0x69   : > { %p2495_p8 = pneg %p2494_p6 }
  0x6b   : > { %p2500_p12 = pnand %p2498_p9, %p2495_p8 }
  0x6d   : > { %2503 = shalt.err (!%p2500_p12)
}
  0x6e   : > { %s2504_s30 = scalar_lea.vmem %s306_s16, 512  ;;  %p2512_p4 = scmp.lt.s32.totalorder %s306_s16, %s306_s16 }
  0x6f   : > { %p2505_p1 = scmp.ne.s32.totalorder %s306_s16, %s2504_s30  ;;  %p2513_p5 = scmp.lt.s32.totalorder %s2504_s30, %s2504_s30 }
  0x71   : > { %p2507_p2 = pnand %p2505_p1, %p2903_p13  ;;  %p2514_p7 = por %p2513_p5, %p2512_p4 }
  0x73   : > { %p2508_p3 = pneg %p2507_p2 }
  0x75   : > { %p2515_p10 = pnand %p2514_p7, %p2508_p3 }
  0x77   : > { %2518 = shalt.err (!%p2515_p10)
}
  0x78   : > { %2281 = dma.hbm_to_vmem [thread:$0]  (!%p2889_p11), %s3340_s3, 512, %s306_s16, [#allocation12], %s2727_s8, %s2727_s8, %s2728_s17  }
  0x79   : > { %s3341_s7 = sld [smem:[#allocation38_spill]] }
  0x7f   : > { %s2519_s2 = scalar_lea.hbm %s3341_s7, 512 }
  0x80   : > { %p2520_p0 = scmp.ne.s32.totalorder %s3341_s7, %s2519_s2  ;;  %p2526_p9 = scmp.lt.u32.totalorder %s2519_s2, %s3341_s7 }
  0x82   : > { %p2522_p6 = pnand %p2520_p0, %p2903_p13 }
  0x84   : > { %p2523_p8 = pneg %p2522_p6 }
  0x86   : > { %p2528_p12 = pnand %p2526_p9, %p2523_p8 }
  0x88   : > { %2531 = shalt.err (!%p2528_p12)
}
  0x89   : > { %s2532_s4 = scalar_lea.vmem %s338_s25, 512  ;;  %p2540_p4 = scmp.lt.s32.totalorder %s338_s25, %s338_s25 }
  0x8a   : > { %p2533_p1 = scmp.ne.s32.totalorder %s338_s25, %s2532_s4  ;;  %p2541_p5 = scmp.lt.s32.totalorder %s2532_s4, %s2532_s4 }
  0x8c   : > { %p2535_p2 = pnand %p2533_p1, %p2903_p13  ;;  %p2542_p7 = por %p2541_p5, %p2540_p4 }
  0x8e   : > { %p2536_p3 = pneg %p2535_p2 }
  0x90   : > { %p2543_p10 = pnand %p2542_p7, %p2536_p3 }
  0x92   : > { %2546 = shalt.err (!%p2543_p10)
}
  0x93   : > { %2287 = dma.hbm_to_vmem [thread:$0]  (!%p2889_p11), %s3341_s7, 512, %s338_s25, [#allocation15], %s2727_s8, %s2727_s8, %s2728_s17  }
  0x94   : > { %s39_s22 = sadd.s32 1, %s2711_s18  ;;  %s42_s28 = sadd.s32 1, %s2715_s19 }
  0x95   : > { %p40_p13 = scmp.ge.s32.totalorder %s39_s22, 2  ;;  %s46_s1 = sadd.s32 1, %s2719_s20 }
  0x96   : > { %s55_s6 = sadd.s32 1, %s2695_s14  ;;  %p62_p6 = scmp.ne.s32.totalorder %s2695_s14, %s2691_s13 }
  0x97   : > { %s3393_s22 = smov (%p40_p13, %s39_s22), 0  ;;  %s3395_s28 = smov (!%p40_p13, %s42_s28), %s2715_s19 }
  0x98   : > { %3342 = sst [smem:[#allocation29_spill]] %s3393_s22  ;;  %s51_s10 = ssub.s32 %s2711_s18, %s3393_s22 }
  0x99   : > { %p44_p0 = scmp.ge.s32.totalorder %s3395_s28, 2  ;;  %p63_p11 = scmp.eq.s32.totalorder %s2723_s21, 0 }
  0x9a   : > { %p68_p8 = scmp.ne.s32.totalorder %s2691_s13, %s2687_s12  ;;  %p3344_p9 = scmp.ne.s32.totalorder %s3330_s24, 0 }
  0x9b   : > { %s3397_s28 = smov (%p44_p0, %s3395_s28), 0  ;;  %s3399_s1 = smov (!%p44_p0, %s46_s1), %s2719_s20 }
  0x9c   : > { %3343 = sst [smem:[#allocation30_spill]] %s3397_s28  ;;  %p3009_p12 = por %p3344_p9, %p68_p8 }
  0x9d   : > { %s246_s17 = smul.u32 %s2711_s18, %s2715_s19  ;;  %p48_p1 = scmp.ge.s32.totalorder %s3399_s1, 2 }
  0x9e   : > { %s247_s25 = smul.u32 %s3397_s28, %s3393_s22  ;;  %p3017_p2 = por %p63_p11, %p62_p6 }
  0x9f   : > { %s253_s12 = sadd.s32 1, %s2683_s11  ;;  %s3401_s1 = smov (%p48_p1, %s3399_s1), 0 }
  0xa0   : > { %3347 = sst [smem:[#allocation31_spill]] %s3401_s1  ;;  %s249_s2 = ssub.s32 %s246_s17, %s247_s25 }
  0xa1   : > { %p2300_p3 = scmp.lt.s32.totalorder %s2723_s21, 8  ;;  %s50_s26 = ssub.s32 %s2719_s20, %s3401_s1 }
  0xa2   : > { %s354_s23 = sand.u32 1, %s2695_s14   ;;  %s52_s9 = sor.u32 %s51_s10, %s50_s26 }
  0xa3   : > { %s250_s29 = sor.u32 %s249_s2, %s50_s26  ;;  %p53_p4 = scmp.eq.s32.totalorder %s52_s9, 0 }
  0xa4   : > { %p251_p5 = scmp.eq.s32.totalorder %s250_s29, 0  ;;  %s1988_s4 = sshll.u32 %s354_s23, 3 }
  0xa5   : > { %s1989_s16 = sshll.u32 %s2719_s20, 1  ;;  %s358_s28 = scalar_lea.vmem [#allocation8], %s1988_s4 }
  0xa6   : > { %s3030_s30 = scalar_select %p53_p4, %s2695_s14, %s55_s6  }
  0xa7   : > { %s3033_s3 = scalar_select %p251_p5, %s2683_s11, %s253_s12  }
  0xa8   : > { %s363_s5 = sadd.s32 %s2711_s18, %s1989_s16  ;;  %s367_s22 = sshll.u32 %s358_s28, 4  ;;  %s3041_s22 = int_to_ptr.vmem [resolvable:$true] %s367_s22 }
  0xa9   : > { %s1990_s7 = sshll.u32 %s363_s5, 7  ;;  %p3047_p7 = pnand %p2300_p3, %p3017_p2 }
  0xaa   : > { %s3039_s1 = scalar_lea.hbm %s3291_s0, %s1990_s7  ;;  %s355_s5 = scalar_lea.sflag [#allocation9], %s354_s23 }
  0xab   : > { %s2547_s28 = scalar_lea.hbm %s3039_s1, 128  ;;  %p2549_p13 = pneg %p3047_p7 }
  0xac   : > { %p2548_p10 = scmp.ne.s32.totalorder %s3039_s1, %s2547_s28  ;;  %s2552_s15 = scalar_lea.hbm %s3291_s0, 512 }
  0xad   : > { %p2553_p11 = scmp.lt.u32.totalorder %s3039_s1, %s3291_s0  ;;  %p2554_p8 = scmp.lt.u32.totalorder %s2552_s15, %s2547_s28 }
  0xae   : > { %p2550_p0 = pnand %p2549_p13, %p2548_p10  ;;  %p2556_p1 = scmp.lt.u32.totalorder %s2547_s28, %s3039_s1 }
  0xaf   : > { %p2555_p9 = por %p2554_p8, %p2553_p11 }
  0xb0   : > { %p2551_p6 = pneg %p2550_p0 }
  0xb1   : > { %p2557_p2 = por %p2556_p1, %p2555_p9 }
  0xb3   : > { %p2558_p3 = pnand %p2557_p2, %p2551_p6 }
  0xb5   : > { %2561 = shalt.err (!%p2558_p3)
}
  0xb6   : > { %s2562_s26 = scalar_lea.vmem %s3041_s22, 128  ;;  %s2731_s23 = smov [#allocation8]  }
  0xb7   : > { %p2563_p4 = scmp.ne.s32.totalorder %s3041_s22, %s2562_s26  ;;  %s2567_s9 = sshll.u32 %s2731_s23, 4  ;;  %s2568_s9 = int_to_ptr.vmem [resolvable:$false] %s2567_s9 }
  0xb8   : > { %s2569_s29 = scalar_lea.vmem %s2568_s9, 256  ;;  %p2570_p0 = scmp.lt.s32.totalorder %s3041_s22, %s2568_s9 }
  0xb9   : > { %p2565_p5 = pnand %p2563_p4, %p2549_p13  ;;  %p2571_p11 = scmp.lt.s32.totalorder %s2569_s29, %s2562_s26 }
  0xbb   : > { %p2566_p10 = pneg %p2565_p5  ;;  %p2572_p8 = por %p2571_p11, %p2570_p0 }
  0xbd   : > { %p2573_p9 = pnand %p2572_p8, %p2566_p10 }
  0xbf   : > { %2576 = shalt.err (!%p2573_p9)
}
  0xc0   : > { %2291 = dma.hbm_to_vmem [thread:$0]  (!%p3047_p7), %s3039_s1, 128, %s3041_s22, %s355_s5  }
  0xc1   : > { %p3349_p6 = scmp.ne.s32.totalorder %s3335_s27, 0 }
  0xc2   : > { %s378_s4 = sand.u32 (!%p3349_p6), 1, %s2691_s13  }
  0xc3   : > { %376 = sbr.rel (%p3349_p6) target bundleno = 2063 (0x80f), region = 56  ;;  %s3079_s16 = sshll.u32 (!%p3349_p6), %s378_s4, 3 }
  0xc4   : > { %s379_s17 = scalar_lea.sflag (!%p3349_p6), [#allocation9], %s378_s4  ;;  %s382_s25 = scalar_lea.vmem (!%p3349_p6), [#allocation8], %s3079_s16 }
  0xca   : > { %2658 = dma.done.wait (%p3009_p12), %s379_s17, 128  }
  0xcb   : > { %2660 = vsyncadd (%p3009_p12), %s379_s17, 4294967168  ;;  %p3350_p13 = scmp.ne.s32.totalorder %s3330_s24, 0 }
  0xcd   : > { %2662 = dma.done.wait (%p3350_p13), [#allocation12], 1024  }
  0xce   : > { %2664 = vsyncadd (%p3350_p13), [#allocation12], 4294966272 }
  0xcf   : > { %2666 = dma.done.wait (%p3350_p13), [#allocation15], 1024  }
  0xd0   : > { %2668 = vsyncadd (%p3350_p13), [#allocation15], 4294966272  ;;  %s3351_s27 = sld [smem:[#allocation23_spill]]  ;;  %s3352_s22 = sld [smem:[#allocation25_spill]] }
  0xd1   : > { %s3353_s1 = sld [smem:[#allocation24_spill]] }
  0xd6   : > { %s430_s10 = sand.u32 1, %s3351_s27   ;;  %p434_p7 = scmp.eq.s32.totalorder %s3352_s22, 0 }
  0xd7   : > { %s3098_s8 = sshll.u32 %s430_s10, 3  ;;  %p435_p12 = scmp.eq.s32.totalorder %s3353_s1, 0 }
  0xd8   : > { %s432_s5 = scalar_lea.vmem [#allocation17], %s3098_s8 }
  0xd9   : > { %p436_p1 = pnand %p435_p12, %p434_p7 }
  0xda   : > { %vm440_vm0 = vcmask (!%p436_p1), 261120   ;;  %vm449_vm1 = vcmask (!%p436_p1), 253952   ;;  %v452_v0 = vlaneseq (!%p436_p1)  ;;  %v2732_v1 = vmov (!%p436_p1), 0.0  }
  0xdb   : > { %439 = sbr.rel (%p436_p1) target bundleno = 234 (0xea), region = 80  ;;  %441 = vst.msk [vmem:[#allocation2] sm:$0xff] (!%p436_p1), %vm440_vm0, %v2732_v1  ;;  %442 = vst.msk [vmem:[#allocation2 + $0x8] sm:$0xff] (!%p436_p1), %vm440_vm0, %v2732_v1  ;;  %vm482_vm3 = vcmask (!%p436_p1), 31744  }
  0xdc   : > { %443 = vst.msk [vmem:[#allocation2 + $0x10] sm:$0xff] (!%p436_p1), %vm440_vm0, %v2732_v1  ;;  %444 = vst.msk [vmem:[#allocation2 + $0x18] sm:$0xff] (!%p436_p1), %vm440_vm0, %v2732_v1  ;;  %v453_v2 = vshrl.u32 (!%p436_p1), %v452_v0, 7  ;;  %v458_v3 = vand.u32 (!%p436_p1), 127, %v452_v0 }
  0xdd   : > { %445 = vst.msk [vmem:[#allocation3] sm:$0xff] (!%p436_p1), %vm440_vm0, %v2732_v1  ;;  %446 = vst.msk [vmem:[#allocation3 + $0x8] sm:$0xff] (!%p436_p1), %vm440_vm0, %v2732_v1 }
  0xde   : > { %447 = vst.msk [vmem:[#allocation3 + $0x10] sm:$0xff] (!%p436_p1), %vm440_vm0, %v2732_v1  ;;  %448 = vst.msk [vmem:[#allocation3 + $0x18] sm:$0xff] (!%p436_p1), %vm440_vm0, %v2732_v1  ;;  %v459_v4 = vmul.u32 (!%p436_p1), 8, %v458_v3  ;;  %v464_v5 = vadd.s32 (!%p436_p1), 1, %v458_v3  ;;  %v454_v6 = vadd.s32 (!%p436_p1), 8, %v453_v2  ;;  %v455_v7 = vadd.s32 (!%p436_p1), 16, %v453_v2 }
  0xdf   : > { %450 = vst.msk [vmem:[#allocation4] sm:$0x1] (!%p436_p1), %vm449_vm1, %v2732_v1  ;;  %451 = vst.msk [vmem:[#allocation5] sm:$0x1] (!%p436_p1), %vm449_vm1, %v2732_v1  ;;  %v456_v8 = vadd.s32 (!%p436_p1), 24, %v453_v2  ;;  %v489_v9 = vadd.s32 (!%p436_p1), 1, %v453_v2 }
  0xe0   : > { %vm460_vm2 = vcmp.ge.s32.totalorder (!%p436_p1), %v453_v2, %v459_v4  ;;  %v465_v10 = vmul.u32 (!%p436_p1), 8, %v464_v5  ;;  %v487_v11 = vmul.u32 (!%p436_p1), 8, %v453_v2  ;;  %vm461_vm4 = vcmp.ge.s32.totalorder (!%p436_p1), %v454_v6, %v459_v4 }
  0xe1   : > { %v490_v12 = vmul.u32 (!%p436_p1), 8, %v489_v9  ;;  %vm462_vm7 = vcmp.ge.s32.totalorder (!%p436_p1), %v455_v7, %v459_v4  ;;  %vm463_vm10 = vcmp.ge.s32.totalorder (!%p436_p1), %v456_v8, %v459_v4  ;;  %vm495_vm1 = vcmask (!%p436_p1), 257024  }
  0xe2   : > { %vm466_vm5 = vcmp.lt.s32.totalorder %v453_v2, %v465_v10  ;;  %vm467_vm6 = vcmp.lt.s32.totalorder %v454_v6, %v465_v10  ;;  %vm468_vm8 = vcmp.lt.s32.totalorder %v455_v7, %v465_v10  ;;  %vm469_vm11 = vcmp.lt.s32.totalorder %v456_v8, %v465_v10 }
  0xe3   : > { %vm470_vm9 = vmand %vm460_vm2, %vm466_vm5  ;;  %vm488_vm13 = vcmp.ge.s32.totalorder %v458_v3, %v487_v11  ;;  %vm491_vm14 = vcmp.lt.s32.totalorder %v458_v3, %v490_v12 }
  0xe4   : > { %v1998_v13 = vsel %vm470_vm9, 1.0, %v2732_v1  ;;  %vm471_vm12 = vmand %vm461_vm4, %vm467_vm6 }
  0xe5   : > { %483 = vst.msk [vmem:[#allocation6] sm:$0xff] %vm482_vm3, %v1998_v13  ;;  %v1999_v14 = vsel %vm471_vm12, 1.0, %v2732_v1  ;;  %vm472_vm15 = vmand %vm462_vm7, %vm468_vm8 }
  0xe6   : > { %484 = vst.msk [vmem:[#allocation6 + $0x8] sm:$0xff] %vm482_vm3, %v1999_v14  ;;  %v2000_v15 = vsel %vm472_vm15, 1.0, %v2732_v1  ;;  %vm473_vm0 = vmand %vm463_vm10, %vm469_vm11 }
  0xe7   : > { %485 = vst.msk [vmem:[#allocation6 + $0x10] sm:$0xff] %vm482_vm3, %v2000_v15  ;;  %v2001_v16 = vsel %vm473_vm0, 1.0, %v2732_v1  ;;  %vm492_vm2 = vmand %vm488_vm13, %vm491_vm14 }
  0xe8   : > { %486 = vst.msk [vmem:[#allocation6 + $0x18] sm:$0xff] %vm482_vm3, %v2001_v16  ;;  %v2002_v17 = vsel %vm492_vm2, 1.0, %v2732_v1 }
  0xe9   : > { %496 = vst.msk [vmem:[#allocation7] sm:$0xf] %vm495_vm1, %v2002_v17 }
  0xea PF: > { %s3354_s24 = sld [smem:[#allocation24_spill]]  ;;  %v3110_v18 = vld [vmem:[%s382_s25] sm:$0xff]  ;;  %v498_v19 = vlaneseq  ;;  %v2733_v37 = vmov 683565275   ;;  %v2734_v39 = vmov 2475754826  }
  0xeb   : > { %v2735_v41 = vmov 2131351028   ;;  %v2736_v43 = vmov 2102212464   ;;  %v2737_v45 = vmov 920167782  }
  0xec   : > { %v499_v21 = vshrl.u32 %v498_v19, 7  ;;  %v2738_v52 = vmov 1326507024   ;;  %s3355_s7 = sld [smem:[#allocation25_spill]] }
  0xf0   : > { %s2003_s28 = sshll.u32 %s3354_s24, 3 }
  0xf1   : > { %v501_v20 = vstv %s2003_s28 }
  0xf2   : > { %v502_v22 = vadd.s32 %v501_v20, %v499_v21  ;;  %p2012_p2 = scmp.ne.s32.totalorder %s3355_s7, 0 }
  0xf3   : > { %s3356_s12 = sld [smem:[#allocation35_spill]] (!%p2012_p2)  ;;  %s3357_s23 = sld [smem:[#allocation37_spill]] (!%p2012_p2) }
  0xf4   : > { %v503_v23 = vadd.s32 1, %v502_v22 }
  0xf6   : > { %v504_v24 = vcvt.s32.f32 %v503_v23 }
  0xf8   : > { %v3113_v25 = vmul.f32 0.09817477, %v504_v24 }
  0xfa   : > { %v509_v26 = vand.u32 2139095040, %v3113_v25  ;;  %v506_v28 = vand.u32 2147483647, %v3113_v25  ;;  %vm508_vm10 = vcmp.lt.s32.totalorder %v3113_v25, 0  ;;  %vm598_vm2 = vweird.f32 %v3113_v25 }
  0xfc   : > { %v510_v27 = vshrl.u32 %v509_v26, 23  ;;  %v513_v31 = vand.u32 8388607, %v506_v28  ;;  %vm507_vm11 = vcmp.le.f32.partialorder %v506_v28, 0.7853982 }
  0xfe   : > { %v2004_v29 = vadd.s32 4294967169, %v510_v27  ;;  %v514_v34 = vor.u32 8388608, %v513_v31 }
 0x100   : > { %v516_v30 = vadd.s32 1, %v2004_v29  ;;  %v554_v54 = vshll.u32 %v514_v34, 8 }
 0x102   : > { %vm517_vm3 = vcmp.gt.s32.totalorder %v516_v30, 0 }
 0x103   : > { %v518_v32 = vsel %vm517_vm3, %v516_v30, 0  ;;  %vm2740_vm3 = vmmov (!%p2012_p2), 0  }
 0x104   : > { %v520_v33 = vand.u32 31, %v518_v32  ;;  %v519_v35 = vshrl.u32 %v518_v32, 5 }
 0x106   : > { %v521_v36 = vsub.s32 32, %v520_v33  ;;  %v523_v38 = vshll.u32 %v2733_v37, %v520_v33  ;;  %v526_v40 = vshll.u32 %v2734_v39, %v520_v33  ;;  %v529_v42 = vshll.u32 %v2735_v41, %v520_v33 }
 0x107   : > { %v532_v44 = vshll.u32 %v2736_v43, %v520_v33  ;;  %v535_v46 = vshll.u32 %v2737_v45, %v520_v33  ;;  %vm538_vm4 = vcmp.lt.s32.totalorder %v519_v35, 1  ;;  %vm541_vm5 = vcmp.lt.s32.totalorder %v519_v35, 4 }
 0x108   : > { %v522_v47 = vshrl.u32 %v2733_v37, %v521_v36  ;;  %v524_v48 = vshrl.u32 %v2734_v39, %v521_v36  ;;  %v527_v49 = vshrl.u32 %v2735_v41, %v521_v36  ;;  %v530_v50 = vshrl.u32 %v2736_v43, %v521_v36 }
 0x109   : > { %v533_v51 = vshrl.u32 %v2737_v45, %v521_v36  ;;  %v536_v53 = vshrl.u32 %v2738_v52, %v521_v36  ;;  %vm539_vm6 = vcmp.lt.s32.totalorder %v519_v35, 2  ;;  %vm540_vm7 = vcmp.lt.s32.totalorder %v519_v35, 3 }
 0x10a   : > { %v525_v55 = vor.u32 %v524_v48, %v523_v38  ;;  %v528_v56 = vor.u32 %v527_v49, %v526_v40  ;;  %v531_v57 = vor.u32 %v530_v50, %v529_v42 }
 0x10b   : > { %v534_v58 = vor.u32 %v533_v51, %v532_v44  ;;  %v537_v59 = vor.u32 %v536_v53, %v535_v46 }
 0x10c   : > { %v542_v60 = vsel %vm538_vm4, %v522_v47, %v525_v55  ;;  %v543_v61 = vsel %vm541_vm5, %v531_v57, 2102212464  ;;  %v546_v62 = vsel %vm538_vm4, %v525_v55, %v528_v56  ;;  %v550_v63 = vsel %vm538_vm4, %v528_v56, %v531_v57 }
 0x10d   : > { %v544_v0 = vsel %vm540_vm7, %v528_v56, %v543_v61  ;;  %v547_v1 = vsel %vm541_vm5, %v534_v58, 920167782  ;;  %v551_v2 = vsel %vm541_vm5, %v537_v59, 1326507024  ;;  %v717_v61 = vld [vmem:[#allocation13 + $0x8] sm:$0xff] (!%p2012_p2)  ;;  %vm727_vm4 = vcmask (!%p2012_p2), 261120  }
 0x10e   : > { %v548_v3 = vsel %vm540_vm7, %v531_v57, %v547_v1  ;;  %v552_v4 = vsel %vm540_vm7, %v534_v58, %v551_v2  ;;  %v545_v5 = vsel %vm539_vm6, %v542_v60, %v544_v0  ;;  %v716_v60 = vld [vmem:[#allocation13] sm:$0xff] (!%p2012_p2)  ;;  %v2741_v1 = vmov (!%p2012_p2), 0.0  }
 0x10f   : > { %v549_v6 = vsel %vm539_vm6, %v546_v62, %v548_v3  ;;  %v553_v7 = vsel %vm539_vm6, %v550_v63, %v552_v4  ;;  %v561_v12 = vmul.u32 %v554_v54, %v545_v5  ;;  %v718_v62 = vld [vmem:[#allocation13 + $0x10] sm:$0xff] (!%p2012_p2)  ;;  %v2739_v63 = vmov (!%p2012_p2), 0.0|0.0   ;;  %2107 = vmatprep.mubr.msk.f32.mxu0 (!%p2012_p2), %vm2740_vm3, %v2741_v1  ;;  %v802_v2 = vld [vmem:[#allocation14] sm:$0xff] (!%p2012_p2)  ;;  %v803_v3 = vld [vmem:[#allocation14 + $0x8] sm:$0xff] (!%p2012_p2)  ;;  %2118 = vmatprep.mubr.msk.f32.mxu1 (!%p2012_p2), %vm2740_vm3, %v2741_v1 }
 0x110   : > { %v3119_v8 = vmul.u32.u64.low %v554_v54, %v553_v7  ;;  %v3120_v9 = vmul.u32.u64.high %v554_v54, %v553_v7, %v3119_v8  ;;  %v3122_v10 = vmul.u32.u64.low %v554_v54, %v549_v6  ;;  %v3123_v11 = vmul.u32.u64.high %v554_v54, %v549_v6, %v3122_v10  ;;  %2205 = vmatprep.subr.bf16.mxu0 (!%p2012_p2), %v2739_v63  ;;  %2211 = vmatprep.subr.bf16.mxu1 (!%p2012_p2), %v2739_v63  ;;  %v804_v5 = vld [vmem:[#allocation14 + $0x10] sm:$0xff] (!%p2012_p2)  ;;  %v805_v6 = vld [vmem:[#allocation14 + $0x18] sm:$0xff] (!%p2012_p2) }
 0x111   : > { %v2206_v0 = vpack.c.bf16 (!%p2012_p2), %v717_v61, %v716_v60  ;;  %v2212_v4 = vpack.c.bf16 (!%p2012_p2), %v803_v3, %v802_v2  ;;  %v2215_v8 = vpack.c.bf16 (!%p2012_p2), %v805_v6, %v804_v5  ;;  %vm1177_vm5 = vcmask (!%p2012_p2), 253952   ;;  %v1030_v3 = vld [vmem:[#allocation3 + $0x18] sm:$0xff] (!%p2012_p2) }
 0x112   : > { %vm563_vm8 = vc.u32 %v3120_v9, %v3122_v10  ;;  %v564_v13 = vadd.s32 1, %v3123_v11  ;;  %v562_v26 = vadd.s32 %v3122_v10, %v3120_v9  ;;  %v2013_v9 = vld [vmem:[%s3356_s12] ss:$0 sm:$0xff] (!%p2012_p2)  ;;  %vm921_vm6 = vcmask (!%p2012_p2), 64512  }
 0x113   : > { %2207 = vmatpush3.bf16.msra.mxu0 (!%p2012_p2), %v2206_v0  ;;  %2213 = vmatpush3.bf16.msra.mxu1 (!%p2012_p2), %v2212_v4  ;;  %v2015_v10 = vld [vmem:[%s3357_s23] ss:$0 sm:$0xff] (!%p2012_p2)  ;;  %v1029_v4 = vld [vmem:[#allocation3 + $0x10] sm:$0xff] (!%p2012_p2) }
 0x114   : > { %v565_v14 = vsel %vm563_vm8, %v564_v13, %v3123_v11  ;;  %2208 = vmatprep.subr.bf16.mxu0 (!%p2012_p2), %v2739_v63  ;;  %2214 = vmatprep.subr.bf16.mxu1 (!%p2012_p2), %v2739_v63  ;;  %v1027_v63 = vld [vmem:[#allocation3] sm:$0xff] (!%p2012_p2) }
 0x115   : > { %v566_v15 = vadd.s32 %v565_v14, %v561_v12 }
 0x117   : > { %v567_v16 = vadd.s32 536870912, %v566_v15  ;;  %2216 = vmatpush3.bf16.msra.mxu1 (!%p2012_p2), %v2215_v8 }
 0x119   : > { %v568_v17 = vshrl.u32 %v567_v16, 30 }
 0x11a   : > { %2119 = vmatmul.mubr.msk.f32.vlgmr.msra.gmra.mrb[0].mxu1 (!%p2012_p2), %vm727_vm4, %v3110_v18 }
 0x11b   : > { %v569_v19 = vshll.u32 %v568_v17, 30  ;;  %v592_v39 = vsub.s32 4, %v568_v17 }
 0x11d   : > { %v570_v20 = vsub.s32 %v566_v15, %v569_v19  ;;  %v593_v42 = vsel %vm508_vm10, %v592_v39, %v568_v17 }
 0x11e   : > { %v595_v45 = vsel %vm507_vm11, 0, %v593_v42 }
 0x11f   : > { %v572_v21 = vsub.s32 0, %v570_v20  ;;  %v599_v46 = vadd.s32 3, %v595_v45  ;;  %v703_v48 = vand.u32 3, %v595_v45 }
 0x121   : > { %v2005_v22 = vmin.u32 %v572_v21, %v570_v20  ;;  %v600_v47 = vand.u32 3, %v599_v46  ;;  %vm708_vm13 = vcmp.eq.s32.totalorder %v703_v48, 2  ;;  %vm705_vm15 = vcmp.eq.s32.totalorder %v703_v48, 0 }
 0x122   : > { %vm704_vm1 = vcmp.lt.s32.totalorder %v703_v48, 2 }
 0x123   : > { %v574_v23 = vclz %v2005_v22  ;;  %vm605_vm12 = vcmp.eq.s32.totalorder %v600_v47, 2  ;;  %vm602_vm14 = vcmp.eq.s32.totalorder %v600_v47, 0  ;;  %vm601_vm0 = vcmp.lt.s32.totalorder %v600_v47, 2 }
 0x125   : > { %v2006_v24 = vadd.s32 4294967294, %v574_v23 }
 0x127   : > { %vm2007_vm9 = vcmp.lt.s32.totalorder %v2006_v24, 0 }
 0x128   : > { %v577_v27 = vsel %vm2007_vm9, 0, %v2006_v24 }
 0x129   : > { %v578_v29 = vsub.s32 32, %v577_v27  ;;  %v579_v30 = vshll.u32 %v570_v20, %v577_v27  ;;  %v582_v31 = vsub.s32 4294967266, %v577_v27 }
 0x12b   : > { %v580_v32 = vshrl.u32 %v562_v26, %v578_v29  ;;  %v583_v33 = vadd.s32 127, %v582_v31 }
 0x12d   : > { %v581_v34 = vor.u32 %v580_v32, %v579_v30  ;;  %v584_v35 = vshll.u32 %v583_v33, 23 }
 0x12f   : > { %v585_v36 = vor.u32 4788187, %v584_v35  ;;  %v588_v37 = vcvt.s32.f32 %v581_v34  ;;  %v1168_v35 = vld [vmem:[#allocation4] sm:$0x1] (!%p2012_p2) }
 0x131   : > { %v586_v38 = vand.u32 2147483647, %v585_v36  ;;  %v1179_v36 = vld [vmem:[#allocation5] sm:$0x1] (!%p2012_p2) }
 0x133   : > { %v589_v40 = vmul.f32 %v588_v37, %v586_v38 }
 0x135   : > { %v590_v41 = vxor.u32 2147483648, %v589_v40 }
 0x137   : > { %v591_v43 = vsel %vm508_vm10, %v590_v41, %v589_v40 }
 0x138   : > { %v594_v44 = vsel %vm507_vm11, %v3113_v25, %v591_v43  ;;  %v719_v25 = vld [vmem:[#allocation13 + $0x18] sm:$0xff] (!%p2012_p2) }
 0x139   : > { %2429 = vcosq.f32 %v594_v44  ;;  %v2209_v7 = vpack.c.bf16 (!%p2012_p2), %v719_v25, %v718_v62  ;;  %v1028_v62 = vld [vmem:[#allocation3 + $0x8] sm:$0xff] (!%p2012_p2) }
 0x13a   : > { %2431 = vsinq.f32 %v594_v44 }
 0x13b   : > { %2210 = vmatpush3.bf16.msra.mxu0 (!%p2012_p2), %v2209_v7 }
 0x13e   : > { %2108 = vmatmul.mubr.msk.f32.vlgmr.msra.gmra.mrb[0].mxu0 (!%p2012_p2), %vm727_vm4, %v3110_v18 }
 0x143   : > { %v2430_v49 = vpop.eup %2429  ;;  %715 = sbr.rel (%p2012_p2) target bundleno = 909 (0x38d), region = 84 }
 0x144   : > { %v2432_v50 = vpop.eup %2431  ;;  %v606_v51 = vxor.u32 2147483648, %v2430_v49 }
 0x145   : > { %v603_v28 = vxor.u32 2147483648, %v2432_v50 }
 0x146   : > { %v607_v52 = vsel %vm605_vm12, %v606_v51, %v2432_v50  ;;  %v710_v53 = vsel %vm708_vm13, %v606_v51, %v2432_v50  ;;  %v885_v50 = vld [vmem:[#allocation2] sm:$0xff] (!%p2012_p2) }
 0x147   : > { %v604_v54 = vsel %vm602_vm14, %v2430_v49, %v603_v28  ;;  %v707_v55 = vsel %vm705_vm15, %v2430_v49, %v603_v28  ;;  %v886_v49 = vld [vmem:[#allocation2 + $0x8] sm:$0xff] (!%p2012_p2) }
 0x148   : > { %v608_v56 = vsel %vm601_vm0, %v604_v54, %v607_v52  ;;  %v711_v57 = vsel %vm704_vm1, %v707_v55, %v710_v53  ;;  %v888_v54 = vld [vmem:[#allocation2 + $0x18] sm:$0xff] (!%p2012_p2)  ;;  %v887_v55 = vld [vmem:[#allocation2 + $0x10] sm:$0xff] (!%p2012_p2) }
 0x149   : > { %v3134_v58 = vsel %vm598_vm2, nan, %v608_v56  ;;  %v3136_v59 = vsel %vm598_vm2, nan, %v711_v57 }
 0x1ed   : > { %v879_v14 = vpop.f32.mrb[0].mxu1 }
 0x1ee   : > { %v880_v15 = vadd.f32 %v2015_v10, %v879_v14  ;;  %v2120_v16 = vpop.f32.mrb[1].mxu1 }
 0x1f0   : > { %2121 = vmatprep.subr.mxu0 %v880_v15  ;;  %2129 = vmatprep.subr.mxu1 %v880_v15 }
 0x1f1   : > { %2122 = vmatpush3.msra.mxu0 %v880_v15  ;;  %2130 = vmatpush3.msra.mxu1 %v880_v15 }
 0x211   : > { %v797_v11 = vpop.f32.mrb[0].mxu0 }
 0x212   : > { %v798_v12 = vadd.f32 %v2013_v9, %v797_v11  ;;  %v2109_v13 = vpop.f32.mrb[1].mxu0 }
 0x214   : > { %v801_v17 = vmax.f32 %v798_v12, 0.0 }
 0x216   : > { %v883_v19 = vmul.f32 %v801_v17, %v3134_v58  ;;  %v884_v20 = vmul.f32 %v801_v17, %v3136_v59 }
 0x218   : > { %889 = vxpose.xlu0.b32.start.end [1/1] (short) (narrow) %v883_v19, 32  ;;  %v1169_v21 = vsel %vm727_vm4, %v883_v19, 0.0  ;;  %v1180_v22 = vsel %vm727_vm4, %v884_v20, 0.0 }
 0x219   : > { %v1170_v23 = vrot.slane %v1169_v21, 4  ;;  %v1181_v24 = vrot.slane %v1180_v22, 4 }
 0x21b   : > { %v1171_v26 = vadd.f32 %v1170_v23, %v1169_v21  ;;  %v1182_v27 = vadd.f32 %v1181_v24, %v1180_v22 }
 0x21d   : > { %v1172_v29 = vrot.slane %v1171_v26, 2  ;;  %v1183_v30 = vrot.slane %v1182_v27, 2 }
 0x21f   : > { %v1173_v31 = vadd.f32 %v1172_v29, %v1171_v26  ;;  %v1184_v32 = vadd.f32 %v1183_v30, %v1182_v27 }
 0x221   : > { %v1174_v33 = vrot.slane %v1173_v31, 1  ;;  %v1185_v34 = vrot.slane %v1184_v32, 1 }
 0x223   : > { %v1175_v37 = vadd.f32 %v1174_v33, %v1173_v31  ;;  %v1186_v38 = vadd.f32 %v1185_v34, %v1184_v32 }
 0x225   : > { %v1176_v39 = vadd.f32 %v1175_v37, %v1168_v35  ;;  %v1187_v40 = vadd.f32 %v1186_v38, %v1179_v36  ;;  %1031 = vxpose.xlu0.b32.start.end [1/1] (short) (narrow) %v884_v20, 32 }
 0x227   : > { %1178 = vst.msk [vmem:[#allocation4] sm:$0x1] %vm1177_vm5, %v1176_v39  ;;  %1188 = vst.msk [vmem:[#allocation5] sm:$0x1] %vm1177_vm5, %v1187_v40 }
 0x298   : > { %v905_v41 = vpop.trf.xlu0 }
 0x299   : > { %2123 = vmatprep.mubr.msk.f32.mxu0 %vm921_vm6, %v905_v41 }
 0x29c   : > { %v906_v42 = vpop.trf.xlu0 }
 0x29d   : > { %2124 = vmatmul.mubr.msk.f32.vlgmr.msra.gmra.mrb[2].mxu0 %vm921_vm6, %v906_v42 }
 0x2a0   : > { %v907_v43 = vpop.trf.xlu0 }
 0x2a1   : > { %2126 = vmatprep.mubr.msk.f32.mxu0 %vm921_vm6, %v907_v43 }
 0x2a4   : > { %v908_v44 = vpop.trf.xlu0 }
 0x2a5   : > { %2127 = vmatmul.mubr.msk.f32.gmra.mrb[4].mxu0 %vm921_vm6, %v908_v44 }
 0x2a8   : > { %v1047_v45 = vpop.trf.xlu0 }
 0x2a9   : > { %2131 = vmatprep.mubr.msk.f32.mxu1 %vm921_vm6, %v1047_v45 }
 0x2ac   : > { %v1048_v46 = vpop.trf.xlu0 }
 0x2ad   : > { %2132 = vmatmul.mubr.msk.f32.vlgmr.msra.gmra.mrb[2].mxu1 %vm921_vm6, %v1048_v46 }
 0x2b0   : > { %v1049_v47 = vpop.trf.xlu0 }
 0x2b1   : > { %2134 = vmatprep.mubr.msk.f32.mxu1 %vm921_vm6, %v1049_v47 }
 0x2b4   : > { %v1050_v48 = vpop.trf.xlu0 }
 0x2b5   : > { %2135 = vmatmul.mubr.msk.f32.gmra.mrb[4].mxu1 %vm921_vm6, %v1050_v48 }
 0x370   : > { %v2125_v51 = vpop.f32.mrb[2].mxu0 }
 0x371   : > { %v1020_v28 = vadd.f32 %v2125_v51, %v886_v49  ;;  %v1000_v52 = vpop.f32.mrb[3].mxu0 }
 0x372   : > { %v1019_v53 = vadd.f32 %v1000_v52, %v885_v50 }
 0x373   : > { %1024 = vst.msk [vmem:[#allocation2 + $0x8] sm:$0xff] %vm727_vm4, %v1020_v28 }
 0x374   : > { %1023 = vst.msk [vmem:[#allocation2] sm:$0xff] %vm727_vm4, %v1019_v53 }
 0x378   : > { %v2128_v56 = vpop.f32.mrb[4].mxu0 }
 0x379   : > { %v1022_v57 = vadd.f32 %v2128_v56, %v888_v54  ;;  %v1010_v60 = vpop.f32.mrb[5].mxu0 }
 0x37a   : > { %v1021_v61 = vadd.f32 %v1010_v60, %v887_v55 }
 0x37b   : > { %1026 = vst.msk [vmem:[#allocation2 + $0x18] sm:$0xff] %vm727_vm4, %v1022_v57 }
 0x37c   : > { %1025 = vst.msk [vmem:[#allocation2 + $0x10] sm:$0xff] %vm727_vm4, %v1021_v61 }
 0x380   : > { %v2133_v0 = vpop.f32.mrb[2].mxu1 }
 0x381   : > { %v1161_v25 = vadd.f32 %v2133_v0, %v1028_v62  ;;  %v1141_v1 = vpop.f32.mrb[3].mxu1 }
 0x382   : > { %v1160_v2 = vadd.f32 %v1141_v1, %v1027_v63 }
 0x383   : > { %1165 = vst.msk [vmem:[#allocation3 + $0x8] sm:$0xff] %vm727_vm4, %v1161_v25 }
 0x384   : > { %1164 = vst.msk [vmem:[#allocation3] sm:$0xff] %vm727_vm4, %v1160_v2 }
 0x388   : > { %v2136_v5 = vpop.f32.mrb[4].mxu1 }
 0x389   : > { %v1163_v6 = vadd.f32 %v2136_v5, %v1030_v3  ;;  %v1151_v7 = vpop.f32.mrb[5].mxu1 }
 0x38a   : > { %v1162_v8 = vadd.f32 %v1151_v7, %v1029_v4 }
 0x38b   : > { %1167 = vst.msk [vmem:[#allocation3 + $0x18] sm:$0xff] %vm727_vm4, %v1163_v6 }
 0x38c   : > { %1166 = vst.msk [vmem:[#allocation3 + $0x10] sm:$0xff] %vm727_vm4, %v1162_v8 }
 0x38d PF: > { %s3358_s9 = sld [smem:[#allocation24_spill]] }
 0x393   : > { %p1189_p3 = scmp.eq.s32.totalorder %s3358_s9, 1 }
 0x395   : > { %p1190_p4 = pnand %p1189_p3, %p434_p7 }
 0x396   : > { %v1198_v9 = vld [vmem:[#allocation7] sm:$0xf] (!%p1190_p4)  ;;  %vm1212_vm7 = vcmask (!%p1190_p4), 1043456   ;;  %vm1199_vm8 = vcmask (!%p1190_p4), 31744   ;;  %v1196_v11 = vld [vmem:[#allocation6 + $0x10] sm:$0xff] (!%p1190_p4)  ;;  %v1195_v12 = vld [vmem:[#allocation6 + $0x8] sm:$0xff] (!%p1190_p4) }
 0x397   : > { %1193 = sbr.rel (%p1190_p4) target bundleno = 1140 (0x474), region = 88  ;;  %v1194_v10 = vld [vmem:[#allocation6] sm:$0xff] (!%p1190_p4)  ;;  %2137 = vmatprep.subr.msk.mxu0 (!%p1190_p4), %vm1212_vm7, %v1198_v9  ;;  %2247 = vmatprep.subr.msk.mxu1 (!%p1190_p4), %vm1212_vm7, %v1198_v9  ;;  %v1197_v13 = vld [vmem:[#allocation6 + $0x18] sm:$0xff] (!%p1190_p4)  ;;  %v1303_v21 = vld [vmem:[#allocation2 + $0x10] sm:$0xff] (!%p1190_p4)  ;;  %vm1309_vm9 = vcmask (!%p1190_p4), 261120  }
 0x398   : > { %2138 = vmatpush3.msk.msra.mxu0 (!%p1190_p4), %vm1212_vm7, %v1198_v9  ;;  %2248 = vmatpush3.msk.msra.mxu1 (!%p1190_p4), %vm1212_vm7, %v1198_v9  ;;  %v1302_v14 = vld [vmem:[#allocation2 + $0x8] sm:$0xff] (!%p1190_p4)  ;;  %v1304_v16 = vld [vmem:[#allocation2 + $0x18] sm:$0xff] (!%p1190_p4)  ;;  %v1301_v19 = vld [vmem:[#allocation2] sm:$0xff] (!%p1190_p4) }
 0x399   : > { %2139 = vmatprep.mubr.msk.f32.mxu0 (!%p1190_p4), %vm1199_vm8, %v1194_v10  ;;  %2142 = vmatprep.mubr.msk.f32.mxu1 (!%p1190_p4), %vm1199_vm8, %v1196_v11  ;;  %v1315_v15 = vld [vmem:[#allocation3 + $0x8] sm:$0xff] (!%p1190_p4)  ;;  %v1317_v17 = vld [vmem:[#allocation3 + $0x18] sm:$0xff] (!%p1190_p4)  ;;  %v1314_v20 = vld [vmem:[#allocation3] sm:$0xff] (!%p1190_p4) }
 0x39a   : > { %2140 = vmatmul.mubr.msk.f32.vlgmr.msra.gmra.mrb[0].mxu0 (!%p1190_p4), %vm1199_vm8, %v1195_v12  ;;  %2143 = vmatmul.mubr.msk.f32.vlgmr.msra.gmra.mrb[0].mxu1 (!%p1190_p4), %vm1199_vm8, %v1197_v13  ;;  %v1316_v22 = vld [vmem:[#allocation3 + $0x10] sm:$0xff] (!%p1190_p4) }
 0x46d   : > { %v2141_v23 = vpop.f32.mrb[0].mxu0  ;;  %v2144_v24 = vpop.f32.mrb[0].mxu1 }
 0x46e   : > { %v1306_v26 = vmul.f32 %v2141_v23, %v1302_v14  ;;  %v1319_v27 = vmul.f32 %v2141_v23, %v1315_v15  ;;  %v1308_v29 = vmul.f32 %v2144_v24, %v1304_v16  ;;  %v1321_v30 = vmul.f32 %v2144_v24, %v1317_v17  ;;  %v1282_v31 = vpop.f32.mrb[1].mxu0  ;;  %v1292_v32 = vpop.f32.mrb[1].mxu1 }
 0x46f   : > { %v1305_v33 = vmul.f32 %v1301_v19, %v1282_v31  ;;  %v1318_v34 = vmul.f32 %v1314_v20, %v1282_v31  ;;  %v1307_v35 = vmul.f32 %v1303_v21, %v1292_v32  ;;  %v1320_v36 = vmul.f32 %v1316_v22, %v1292_v32 }
 0x470   : > { %1311 = vst.msk [vmem:[#allocation2 + $0x8] sm:$0xff] %vm1309_vm9, %v1306_v26  ;;  %1323 = vst.msk [vmem:[#allocation3 + $0x8] sm:$0xff] %vm1309_vm9, %v1319_v27 }
 0x471   : > { %1313 = vst.msk [vmem:[#allocation2 + $0x18] sm:$0xff] %vm1309_vm9, %v1308_v29  ;;  %1325 = vst.msk [vmem:[#allocation3 + $0x18] sm:$0xff] %vm1309_vm9, %v1321_v30 }
 0x472   : > { %1310 = vst.msk [vmem:[#allocation2] sm:$0xff] %vm1309_vm9, %v1305_v33  ;;  %1322 = vst.msk [vmem:[#allocation3] sm:$0xff] %vm1309_vm9, %v1318_v34 }
 0x473   : > { %1312 = vst.msk [vmem:[#allocation2 + $0x10] sm:$0xff] %vm1309_vm9, %v1307_v35  ;;  %1324 = vst.msk [vmem:[#allocation3 + $0x10] sm:$0xff] %vm1309_vm9, %v1320_v36 }
 0x474 PF: > { %s3360_s4 = sld [smem:[#allocation25_spill]] }
 0x47a   : > { %p2030_p5 = scmp.ne.s32.totalorder %s3360_s4, 1 }
 0x47b   : > { %v1330_v37 = vld [vmem:[#allocation11] sm:$0xff] (!%p2030_p5)  ;;  %v1331_v38 = vld [vmem:[#allocation11 + $0x8] sm:$0xff] (!%p2030_p5)  ;;  %v1332_v39 = vld [vmem:[#allocation11 + $0x10] sm:$0xff] (!%p2030_p5)  ;;  %v2742_v40 = vmov (!%p2030_p5), 0.0|0.0   ;;  %vm2743_vm10 = vmmov (!%p2030_p5), 0   ;;  %v2744_v43 = vmov (!%p2030_p5), 0.0  }
 0x47c   : > { %1329 = sbr.rel (%p2030_p5) target bundleno = 2033 (0x7f1), region = 92  ;;  %2217 = vmatprep.subr.bf16.mxu0 (!%p2030_p5), %v2742_v40  ;;  %v2218_v41 = vpack.c.bf16 (!%p2030_p5), %v1331_v38, %v1330_v37  ;;  %v1333_v42 = vld [vmem:[#allocation11 + $0x18] sm:$0xff] (!%p2030_p5)  ;;  %2153 = vmatprep.mubr.msk.f32.mxu0 (!%p2030_p5), %vm2743_vm10, %v2744_v43  ;;  %vm1341_vm11 = vcmask (!%p2030_p5), 261120   ;;  %v1422_v45 = vld [vmem:[#allocation3] sm:$0xff] (!%p2030_p5)  ;;  %v1425_v49 = vld [vmem:[#allocation3 + $0x18] sm:$0xff] (!%p2030_p5)  ;;  %s3361_s25 = sld [smem:[#allocation33_spill]] (!%p2030_p5) }
 0x47d   : > { %2223 = vmatprep.subr.bf16.mxu1 (!%p2030_p5), %v2742_v40  ;;  %2164 = vmatprep.mubr.msk.f32.mxu1 (!%p2030_p5), %vm2743_vm10, %v2744_v43  ;;  %v2221_v44 = vpack.c.bf16 (!%p2030_p5), %v1333_v42, %v1332_v39  ;;  %v1423_v46 = vld [vmem:[#allocation3 + $0x8] sm:$0xff] (!%p2030_p5)  ;;  %v1424_v48 = vld [vmem:[#allocation3 + $0x10] sm:$0xff] (!%p2030_p5)  ;;  %v1592_v53 = vld [vmem:[#allocation6 + $0x18] sm:$0xff] (!%p2030_p5)  ;;  %vm1671_vm12 = vcmask (!%p2030_p5), 1043456   ;;  %vm1667_vm13 = vcmask (!%p2030_p5), 31744   ;;  %s3362_s1 = sld [smem:[#allocation39_spill]] (!%p2030_p5) }
 0x47e   : > { %2219 = vmatpush3.bf16.msra.mxu0 (!%p2030_p5), %v2218_v41  ;;  %v2224_v47 = vpack.c.bf16 (!%p2030_p5), %v1423_v46, %v1422_v45  ;;  %v1589_v50 = vld [vmem:[#allocation6] sm:$0xff] (!%p2030_p5)  ;;  %v2227_v51 = vpack.c.bf16 (!%p2030_p5), %v1425_v49, %v1424_v48  ;;  %v1590_v28 = vld [vmem:[#allocation6 + $0x8] sm:$0xff] (!%p2030_p5)  ;;  %v2035_v0 = vld [vmem:[#allocation4] ss:$0 sm:$0xff] (!%p2030_p5) }
 0x47f   : > { %2220 = vmatprep.subr.bf16.mxu0 (!%p2030_p5), %v2742_v40  ;;  %v2236_v52 = vpack.c.bf16 (!%p2030_p5), %v1590_v28, %v1589_v50  ;;  %v1418_v61 = vld [vmem:[#allocation2] sm:$0xff] (!%p2030_p5)  ;;  %v1419_v62 = vld [vmem:[#allocation2 + $0x8] sm:$0xff] (!%p2030_p5)  ;;  %v1420_v4 = vld [vmem:[#allocation2 + $0x10] sm:$0xff] (!%p2030_p5) }
 0x480   : > { %2225 = vmatpush3.bf16.msra.mxu1 (!%p2030_p5), %v2224_v47  ;;  %v2036_v25 = vld [vmem:[#allocation5] ss:$0 sm:$0xff] (!%p2030_p5)  ;;  %v2230_v1 = vpack.c.bf16 (!%p2030_p5), %v1419_v62, %v1418_v61  ;;  %v1421_v5 = vld [vmem:[#allocation2 + $0x18] sm:$0xff] (!%p2030_p5)  ;;  %v1666_v10 = vld [vmem:[#allocation7] sm:$0xf] (!%p2030_p5) }
 0x481   : > { %2226 = vmatprep.subr.bf16.mxu1 (!%p2030_p5), %v2742_v40  ;;  %v2233_v8 = vpack.c.bf16 (!%p2030_p5), %v1421_v5, %v1420_v4  ;;  %v1749_v13 = vld [vmem:[#allocation16] sm:$0xff] (!%p2030_p5)  ;;  %v1750_v14 = vld [vmem:[#allocation16 + $0x8] sm:$0xff] (!%p2030_p5)  ;;  %v1751_v15 = vld [vmem:[#allocation16 + $0x10] sm:$0xff] (!%p2030_p5) }
 0x482   : > { %2222 = vmatpush3.bf16.msra.mxu0 (!%p2030_p5), %v2221_v44  ;;  %v2031_v55 = vld [vmem:[%s3361_s25] ss:$0 sm:$0xff] (!%p2030_p5)  ;;  %v2242_v16 = vpack.c.bf16 (!%p2030_p5), %v1750_v14, %v1749_v13  ;;  %v1752_v17 = vld [vmem:[#allocation16 + $0x18] sm:$0xff] (!%p2030_p5) }
 0x483   : > { %2235 = vmatprep.subr.bf16.mxu0 %v2742_v40  ;;  %v2245_v19 = vpack.c.bf16 %v1752_v17, %v1751_v15  ;;  %v2040_v26 = vld [vmem:[%s3362_s1] ss:$0 sm:$0xff] }
 0x484   : > { %2228 = vmatpush3.bf16.msra.mxu1 %v2227_v51 }
 0x485   : > { %2154 = vmatmul.mubr.msk.f32.vlgmr.msra.gmra.mrb[0].mxu0 %vm1341_vm11, %v3110_v18  ;;  %2229 = vmatprep.subr.bf16.mxu1 %v2742_v40  ;;  %v1591_v18 = vld [vmem:[#allocation6 + $0x10] sm:$0xff] }
 0x486   : > { %2186 = vmatprep.mubr.msk.f32.mxu0 %vm2743_vm10, %v2744_v43  ;;  %2237 = vmatpush3.bf16.msra.mxu0 %v2236_v52  ;;  %v2239_v54 = vpack.c.bf16 %v1592_v53, %v1591_v18 }
 0x487   : > { %2238 = vmatprep.subr.bf16.mxu0 %v2742_v40 }
 0x48a   : > { %2240 = vmatpush3.bf16.msra.mxu0 %v2239_v54 }
 0x48b   : > { %2189 = vmatprep.subr.mxu0 %v2744_v43 }
 0x558   : > { %v1411_v56 = vpop.f32.mrb[0].mxu0 }
 0x559   : > { %v1412_v57 = vadd.f32 %v2031_v55, %v1411_v56  ;;  %v2155_v60 = vpop.f32.mrb[1].mxu0 }
 0x55b   : > { %v1415_v63 = vmax.f32 %v1412_v57, 0.0 }
 0x55d   : > { %v1416_v2 = vmul.f32 %v1415_v63, %v3134_v58  ;;  %v1417_v3 = vmul.f32 %v1415_v63, %v3136_v59 }
 0x55f   : > { %v1579_v6 = vmul.f32 %v2035_v0, %v1416_v2  ;;  %v1587_v7 = vmul.f32 %v2036_v25, %v1417_v3  ;;  %2165 = vmatmul.mubr.msk.f32.vlgmr.msra.gmra.mrb[0].mxu1 %vm1341_vm11, %v1417_v3 }
 0x560   : > { %2231 = vmatpush3.bf16.msra.mxu1 %v2230_v1  ;;  %2175 = vmatprep.mubr.msk.f32.mxu1 %vm2743_vm10, %v2744_v43 }
 0x561   : > { %v1588_v9 = vadd.f32 %v1587_v7, %v1579_v6  ;;  %2232 = vmatprep.subr.bf16.mxu1 %v2742_v40 }
 0x563   : > { %2187 = vmatmul.mubr.msk.f32.vlgmr.msra.gmra.mrb[2].mxu0 %vm1341_vm11, %v1588_v9 }
 0x564   : > { %2234 = vmatpush3.bf16.msra.mxu1 %v2233_v8  ;;  %2190 = vmatpush3.msk.msra.mxu0 %vm1671_vm12, %v1666_v10 }
 0x565   : > { %2191 = vmatprep.mubr.msk.f32.mxu0 %vm2743_vm10, %v2744_v43  ;;  %2241 = vmatprep.subr.bf16.mxu1 %v2742_v40 }
 0x567   : > { %2176 = vmatmul.mubr.msk.f32.vlgmr.msra.gmra.mrb[0].mxu1 %vm1341_vm11, %v1416_v2 }
 0x568   : > { %2202 = vmatprep.mubr.msk.f32.mxu1 %vm2743_vm10, %v2744_v43  ;;  %2243 = vmatpush3.bf16.msra.mxu1 %v2242_v16 }
 0x569   : > { %2244 = vmatprep.subr.bf16.mxu1 %v2742_v40 }
 0x56c   : > { %2246 = vmatpush3.bf16.msra.mxu1 %v2245_v19 }
 0x636   : > { %v1662_v58 = vpop.f32.mrb[2].mxu0 }
 0x637   : > { %v2188_v59 = vpop.f32.mrb[3].mxu0  ;;  %2192 = vmatmul.mubr.msk.f32.vlgmr.msra.gmra.mrb[4].mxu0 %vm1667_vm13, %v1662_v58 }
 0x63a   : > { %v1568_v11 = vpop.f32.mrb[0].mxu1 }
 0x63b   : > { %v2177_v12 = vpop.f32.mrb[1].mxu1 }
 0x70a   : > { %v1741_v20 = vpop.f32.mrb[4].mxu0 }
 0x70b   : > { %v1745_v21 = vmax.f32 %v1741_v20, 0.0001  ;;  %v2193_v22 = vpop.f32.mrb[5].mxu0 }
 0x70d   : > { %2433 = vrcp.f32 %v1745_v21 }
 0x717   : > { %v2434_v23 = vpop.eup %2433 }
 0x718   : > { %v1748_v24 = vmul.f32 %v2434_v23, %v1568_v11 }
 0x71a   : > { %2203 = vmatmul.mubr.msk.f32.vlgmr.msra.gmra.mrb[2].mxu1 %vm1341_vm11, %v1748_v24 }
 0x7ed   : > { %v1829_v27 = vpop.f32.mrb[2].mxu1 }
 0x7ee   : > { %v1830_v29 = vadd.f32 %v2040_v26, %v1829_v27  ;;  %v2204_v30 = vpop.f32.mrb[3].mxu1 }
 0x7f0   : > { %1833 = vst.msk [vmem:[%s432_s5] sm:$0xff] %vm1341_vm11, %v1830_v29 }
 0x7f1 PF: > { %s3363_s24 = sld [smem:[#allocation25_spill]]  ;;  %s3364_s28 = sld [smem:[#allocation24_spill]] }
 0x7f2   : > { %s3365_s7 = sld [smem:[#allocation26_spill]]  ;;  %s3367_s15 = sld [smem:[#allocation27_spill]] }
 0x7f3   : > { %s1851_s26 = sshll.u32 %s432_s5, 4  ;;  %s3368_s16 = sld [smem:[#allocation40_spill]]  ;;  %s3219_s26 = int_to_ptr.vmem [resolvable:$true] %s1851_s26 }
 0x7f4   : > { %s1835_s27 = scalar_lea.sflag [#allocation10], %s430_s10  ;;  %s2577_s22 = scalar_lea.vmem %s3219_s26, 128 }
 0x7f5   : > { %p2578_p10 = scmp.ne.s32.totalorder %s3219_s26, %s2577_s22  ;;  %s2745_s8 = smov [#allocation17]  }
 0x7f6   : > { %s2581_s5 = sshll.u32 %s2745_s8, 4  ;;  %s2582_s5 = int_to_ptr.vmem [resolvable:$false] %s2581_s5 }
 0x7f7   : > { %s1842_s12 = smul.u32 %s3364_s28, %s3363_s24  ;;  %s2583_s1 = scalar_lea.vmem %s2582_s5, 256 }
 0x7f8   : > { %s2043_s2 = sshll.u32 %s3365_s7, 1  ;;  %p3370_p0 = scmp.ne.s32.totalorder %s3367_s15, 0 }
 0x7f9   : > { %s1847_s23 = sadd.s32 %s2043_s2, %s1842_s12  ;;  %s3369_s25 = smov %s3368_s16 }
 0x7fa   : > { %s2044_s9 = sshll.u32 %s1847_s23, 7  ;;  %p2579_p11 = pnand %p2578_p10, %p3370_p0 }
 0x7fb   : > { %s1849_s17 = scalar_lea.hbm %s3368_s16, %s2044_s9  ;;  %p2584_p9 = scmp.lt.s32.totalorder %s3219_s26, %s2582_s5 }
 0x7fc   : > { %p2580_p8 = pneg %p2579_p11  ;;  %p2585_p6 = scmp.lt.s32.totalorder %s2583_s1, %s2577_s22 }
 0x7fe   : > { %p2586_p13 = por %p2585_p6, %p2584_p9 }
 0x800   : > { %p2587_p7 = pnand %p2586_p13, %p2580_p8 }
 0x802   : > { %2590 = shalt.err (!%p2587_p7)
}
 0x803   : > { %s2591_s24 = scalar_lea.hbm %s1849_s17, 128  ;;  %s2595_s7 = scalar_lea.hbm %s3369_s25, 512 }
 0x804   : > { %p2592_p12 = scmp.ne.s32.totalorder %s1849_s17, %s2591_s24  ;;  %p2596_p3 = scmp.lt.u32.totalorder %s1849_s17, %s3369_s25 }
 0x805   : > { %p2597_p4 = scmp.lt.u32.totalorder %s2595_s7, %s2591_s24  ;;  %p2599_p10 = scmp.lt.u32.totalorder %s2591_s24, %s1849_s17 }
 0x806   : > { %p2593_p1 = pnand %p2592_p12, %p3370_p0 }
 0x807   : > { %p2598_p5 = por %p2597_p4, %p2596_p3 }
 0x808   : > { %p2594_p2 = pneg %p2593_p1 }
 0x809   : > { %p2600_p11 = por %p2599_p10, %p2598_p5 }
 0x80b   : > { %p2601_p8 = pnand %p2600_p11, %p2594_p2 }
 0x80d   : > { %2604 = shalt.err (!%p2601_p8)
}
 0x80e   : > { %2273 = dma.vmem_to_hbm [thread:$0]  (%p3370_p0), %s3219_s26, 128, %s1849_s17, %s1835_s27  }
 0x80f PF: > { %s3371_s2 = sld [smem:[#allocation22_spill]]  ;;  %s3372_s23 = sld [smem:[#allocation28_spill]] }
 0x810   : > { %p2305_p9 = scmp.ge.s32.totalorder %s2723_s21, 2 }
 0x815   : > { %s1863_s9 = sand.u32 1, %s3371_s2   ;;  %p3373_p6 = scmp.ne.s32.totalorder %s3372_s23, 0 }
 0x816   : > { %s1864_s29 = scalar_lea.sflag [#allocation10], %s1863_s9 }
 0x817   : > { %p2293_p13 = pnand %p2305_p9, %p3373_p6 }
 0x819   : > { %2670 = dma.done.wait (!%p2293_p13), %s1864_s29, 128  }
 0x81a   : > { %2672 = vsyncadd (!%p2293_p13), %s1864_s29, 4294967168  ;;  %s27_s21 = sadd.s32 1, %s2723_s21   ;;  %s3375_s15 = sld [smem:[#allocation23_spill]] }
 0x81b   : > { %p3247_p7 = scmp.ge.s32.totalorder %s27_s21, 10   ;;  %s3376_s26 = smov %s3030_s30 }
 0x81c   : > { %s3377_s27 = sld [smem:[#allocation29_spill]]  ;;  %s3378_s22 = sld [smem:[#allocation30_spill]] }
 0x81d   : > { %s3379_s8 = sld [smem:[#allocation31_spill]]  ;;  %s3381_s10 = smov %s2683_s11 }
 0x81e   : > { %s3382_s11 = smov %s3033_s3  ;;  %s3383_s12 = smov %s2691_s13 }
 0x81f   : > { %s3384_s13 = smov %s2695_s14  ;;  %s3385_s14 = smov %s3376_s26 }
 0x820   : > { %s3380_s30 = smov %s3375_s15  ;;  %s3386_s15 = smov %s2711_s18 }
 0x821   : > { %s3387_s16 = smov %s2715_s19  ;;  %s3388_s17 = smov %s2719_s20 }
 0x822   : > { %s3389_s18 = smov %s3377_s27  ;;  %s3390_s19 = smov %s3378_s22 }
 0x823   : > { %s3391_s20 = smov %s3379_s8  ;;  %26 = sbr.rel (!%p3247_p7) target bundleno = 22 (0x16), region = 133 }
 0x82a   :  { %1869 = vsyncpa [#allocation9], 1 }
 0x82b   :  { %1871 = vsyncpa [#allocation9 + $0x1], 1 }
 0x82c   :  { %1872 = vsyncpa [#allocation12], 1 }
 0x82d   :  { %1873 = vsyncpa [#allocation15], 1 }
 0x82e   :  { %1874 = vsyncpa [#allocation10], 1 }
 0x82f   :  { %1876 = vsyncpa [#allocation10 + $0x1], 1 }

</bundles_post_ra>
